<compile_context>
chip_gen: v5e
topology: v5e:2x2
jax: 0.10.0
libtpu: 0.0.40
codegen_flags: <defaults>
</compile_context>

<pallas_src>
import functools

import jax
import jax.numpy as jnp
from jax import lax
from jax.experimental import pallas as pl
from jax.experimental.pallas import tpu as pltpu

LANES = 128  # pad all channel/feature dims to one full vreg lane width


# ----------------------------- Pallas kernels ------------------------------ #

def _conv_pool_relu_kernel(p_ref, w_ref, b_ref, o_ref):
    """Fused conv(im2col matmul) + bias + 2x2 maxpool + ReLU.

    p_ref: (4, TM, K)  patches, leading dim = pool-window position u
    w_ref: (K, 128)    conv weight (OC zero-padded to 128)
    b_ref: (1, 128)    bias (padded)
    o_ref: (TM, 128)   pooled activation
    """
    w = w_ref[...]
    y0 = jnp.dot(p_ref[0], w, preferred_element_type=jnp.float32)
    y1 = jnp.dot(p_ref[1], w, preferred_element_type=jnp.float32)
    y2 = jnp.dot(p_ref[2], w, preferred_element_type=jnp.float32)
    y3 = jnp.dot(p_ref[3], w, preferred_element_type=jnp.float32)
    m = jnp.maximum(jnp.maximum(y0, y1), jnp.maximum(y2, y3))
    # max(a+b, c+b) == max(a,c)+b -> add bias once, after the pool
    o_ref[...] = jnp.maximum(m + b_ref[...], 0.0)


def _conv2_fc_head_kernel(p_ref, w2_ref, b2_ref, wf1_ref, bf1_ref,
                          wf2_ref, bf2_ref, o_ref, *, n_batch):
    """Fused conv2 + bias + pool + ReLU + fc1 + ReLU + fc2 + log_softmax(dim=0).

    p_ref  : (4*16*N, 250) conv2 im2col patches, row = u*(16N) + p*N + n
    w2_ref : (250, 128)    conv2 weight (OC padded)
    wf1_ref: (16, 128, 128) fc1 weight, permuted so row-block p matches spatial pos p
    wf2_ref: (128, 128)     fc2 weight (padded)
    o_ref  : (N, 128)       log-softmax(dim=0) output (cols >=10 are padding)
    """
    m2 = 16 * n_batch
    y = jnp.dot(p_ref[...], w2_ref[...], preferred_element_type=jnp.float32)  # (4*m2,128)
    m = jnp.maximum(jnp.maximum(y[0:m2], y[m2:2 * m2]),
                    jnp.maximum(y[2 * m2:3 * m2], y[3 * m2:4 * m2]))
    a2 = jnp.maximum(m + b2_ref[...], 0.0)           # (16N, 128), rows = p*N + n

    # fc1: accumulate over the 16 spatial positions (static slices, 2-D matmuls only)
    acc = jnp.zeros((n_batch, LANES), jnp.float32)
    for p in range(16):
        xp = a2[p * n_batch:(p + 1) * n_batch, :]     # (N, 128)
        acc = acc + jnp.dot(xp, wf1_ref[p], preferred_element_type=jnp.float32)
    h = jnp.maximum(acc + bf1_ref[...], 0.0)          # fc1 + ReLU
    # TODO(synk): F.dropout is identity in inference mode.

    logits = jnp.dot(h, wf2_ref[...], preferred_element_type=jnp.float32) + bf2_ref[...]

    # log_softmax over dim=0 (batch dim), exactly as in the reference module
    mx = jnp.max(logits, axis=0, keepdims=True)
    e = jnp.exp(logits - mx)
    s = jnp.sum(e, axis=0, keepdims=True)
    o_ref[...] = (logits - mx - jnp.log(s)).astype(o_ref.dtype)


# ----------------------------- Pallas wrappers ------------------------------ #

def conv1_stage(patches, w, b):
    """patches: (4, N*144, 25) -> pooled activation (N*144, 128)."""
    _, m1, k1 = patches.shape
    tm = 144                                   # one pooled 12x12 image per grid step
    return pl.pallas_call(
        _conv_pool_relu_kernel,
        out_shape=jax.ShapeDtypeStruct((m1, LANES), jnp.float32),
        grid=(m1 // tm,),
        in_specs=[
            pl.BlockSpec((4, tm, k1), lambda i: (0, i, 0)),
            pl.BlockSpec((k1, LANES), lambda i: (0, 0)),
            pl.BlockSpec((1, LANES), lambda i: (0, 0)),
        ],
        out_specs=pl.BlockSpec((tm, LANES), lambda i: (i, 0)),
        compiler_params=pltpu.CompilerParams(dimension_semantics=("parallel",)),
    )(patches, w, b)


def conv2_fc_stage(patches, w2, b2, wf1, bf1, wf2, bf2, n_batch):
    """patches: (64*N, 250) -> log_softmax output (N, 128) (cols >=10 padding)."""
    m4, k2 = patches.shape
    kernel = functools.partial(_conv2_fc_head_kernel, n_batch=n_batch)
    return pl.pallas_call(
        kernel,
        out_shape=jax.ShapeDtypeStruct((n_batch, LANES), jnp.float32),
        grid=(1,),
        in_specs=[
            pl.BlockSpec((m4, k2), lambda i: (0, 0)),
            pl.BlockSpec((k2, LANES), lambda i: (0, 0)),
            pl.BlockSpec((1, LANES), lambda i: (0, 0)),
            pl.BlockSpec((16, LANES, LANES), lambda i: (0, 0, 0)),
            pl.BlockSpec((1, LANES), lambda i: (0, 0)),
            pl.BlockSpec((LANES, LANES), lambda i: (0, 0)),
            pl.BlockSpec((1, LANES), lambda i: (0, 0)),
        ],
        out_specs=pl.BlockSpec((n_batch, LANES), lambda i: (0, 0)),
        compiler_params=pltpu.CompilerParams(dimension_semantics=("arbitrary",)),
    )(patches, w2, b2, wf1, bf1, wf2, bf2)


# --------------------------------- Glue ------------------------------------ #

def _conv1_patches(x_nchw):
    """(N,1,28,28) -> (4, N*144, 25); row order within u-block = (n, ph, pw)."""
    n = x_nchw.shape[0]
    xi = x_nchw[:, 0, :, :]                                        # (N,28,28)
    cols = [xi[:, i:i + 24, j:j + 24] for i in range(5) for j in range(5)]
    p1 = jnp.stack(cols, axis=-1)                                  # (N,24,24,25)
    p1 = p1.reshape(n, 12, 2, 12, 2, 25)                           # (n,ph,a,pw,b,k)
    p1 = jnp.transpose(p1, (2, 4, 0, 1, 3, 5))                     # (a,b,n,ph,pw,k)
    return p1.reshape(4, n * 144, 25)


def _conv2_patches(a1_flat, n_batch):
    """(N*144,128) -> (4*16*N, 250); row = u*(16N) + p*N + n, patch order (kh,kw,ic)."""
    a1 = a1_flat.reshape(n_batch, 12, 12, LANES)[:, :, :, :10]     # (N,12,12,10)
    cols = [a1[:, i:i + 8, j:j + 8, :] for i in range(5) for j in range(5)]
    p2 = jnp.concatenate(cols, axis=-1)                            # (N,8,8,250)
    p2 = p2.reshape(n_batch, 4, 2, 4, 2, 250)                      # (n,ph,a,pw,b,k)
    p2 = jnp.transpose(p2, (2, 4, 1, 3, 0, 5))                     # (a,b,ph,pw,n,k)
    return p2.reshape(4 * 16 * n_batch, 250)


def prepare_params(p):
    """Permute / zero-pad PyTorch-layout weights once, outside the hot path."""
    w1 = jnp.transpose(p["conv1_w"][:, 0, :, :], (1, 2, 0)).reshape(25, 10)
    w1 = jnp.pad(w1, ((0, 0), (0, LANES - 10)))
    b1 = jnp.pad(p["conv1_b"], (0, LANES - 10)).reshape(1, LANES)

    w2 = jnp.transpose(p["conv2_w"], (2, 3, 1, 0)).reshape(250, 20)
    w2 = jnp.pad(w2, ((0, 0), (0, LANES - 20)))
    b2 = jnp.pad(p["conv2_b"], (0, LANES - 20)).reshape(1, LANES)

    # fc1 weight: (50, 320) with col index c*16 + p  ->  (p, c_pad, o_pad)
    wf1 = jnp.transpose(p["fc1_w"].reshape(50, 20, 16), (2, 1, 0))  # (16,20,50)
    wf1 = jnp.pad(wf1, ((0, 0), (0, LANES - 20), (0, LANES - 50)))  # (16,128,128)
    bf1 = jnp.pad(p["fc1_b"], (0, LANES - 50)).reshape(1, LANES)

    wf2 = jnp.pad(jnp.transpose(p["fc2_w"]), ((0, LANES - 50), (0, LANES - 10)))
    bf2 = jnp.pad(p["fc2_b"], (0, LANES - 10)).reshape(1, LANES)
    return dict(w1=w1, b1=b1, w2=w2, b2=b2, wf1=wf1, bf1=bf1, wf2=wf2, bf2=bf2)


@jax.jit
def model_forward(x_nchw, prepped):
    """Reproduces Model.forward (inference mode)."""
    n = x_nchw.shape[0]
    x = x_nchw.astype(jnp.float32)
    patches1 = _conv1_patches(x)
    a1 = conv1_stage(patches1, prepped["w1"], prepped["b1"])       # (N*144, 128)
    patches2 = _conv2_patches(a1, n)
    out = conv2_fc_stage(patches2, prepped["w2"], prepped["b2"],
                         prepped["wf1"], prepped["bf1"],
                         prepped["wf2"], prepped["bf2"], n)        # (N, 128)
    return out[:, :10]


def reference_forward(x, p):
    """Pure-JAX/XLA reference of the PyTorch module (inference mode)."""
    dn = ("NCHW", "OIHW", "NCHW")
    y = lax.conv_general_dilated(x, p["conv1_w"], (1, 1), "VALID", dimension_numbers=dn)
    y = y + p["conv1_b"].reshape(1, -1, 1, 1)
    y = lax.reduce_window(y, -jnp.inf, lax.max, (1, 1, 2, 2), (1, 1, 2, 2), "VALID")
    y = jnp.maximum(y, 0.0)
    y = lax.conv_general_dilated(y, p["conv2_w"], (1, 1), "VALID", dimension_numbers=dn)
    y = y + p["conv2_b"].reshape(1, -1, 1, 1)
    y = lax.reduce_window(y, -jnp.inf, lax.max, (1, 1, 2, 2), (1, 1, 2, 2), "VALID")
    y = jnp.maximum(y, 0.0)
    y = y.reshape(y.shape[0], -1)                                   # NCHW flatten (=.view(-1,320))
    y = jnp.maximum(y @ p["fc1_w"].T + p["fc1_b"], 0.0)
    y = y @ p["fc2_w"].T + p["fc2_b"]
    return jax.nn.log_softmax(y, axis=0)


def init_params(key):
    """Deterministic synthetic parameters with PyTorch Conv2d/Linear shapes."""
    ks = jax.random.split(key, 8)
    return {
        "conv1_w": 0.1 * jax.random.normal(ks[0], (10, 1, 5, 5), jnp.float32),
        "conv1_b": 0.1 * jax.random.normal(ks[1], (10,), jnp.float32),
        "conv2_w": 0.1 * jax.random.normal(ks[2], (20, 10, 5, 5), jnp.float32),
        "conv2_b": 0.1 * jax.random.normal(ks[3], (20,), jnp.float32),
        "fc1_w": 0.05 * jax.random.normal(ks[4], (50, 320), jnp.float32),
        "fc1_b": 0.05 * jax.random.normal(ks[5], (50,), jnp.float32),
        "fc2_w": 0.05 * jax.random.normal(ks[6], (10, 50), jnp.float32),
        "fc2_b": 0.05 * jax.random.normal(ks[7], (10,), jnp.float32),
    }


if __name__ == "__main__":
    key = jax.random.PRNGKey(0)
    k_in, k_p = jax.random.split(key)
    params = init_params(k_p)
    prepped = prepare_params(params)
    # MNIST geometry is forced by fc1 (320 = 20*4*4): input must be (N, 1, 28, 28).
    x = jax.random.normal(k_in, (2, 1, 28, 28), jnp.float32)

    out = jax.block_until_ready(model_forward(x, prepped))
    assert out.shape == (2, 10) and out.dtype == jnp.float32

    ref = jax.block_until_ready(reference_forward(x, params))
    assert jnp.allclose(out, ref, atol=2e-2, rtol=2e-2), (
        f"mismatch vs reference: max abs diff {float(jnp.max(jnp.abs(out - ref)))}")

    print("KERNEL_OK")
</pallas_src>

<mosaic_0001>
module attributes {stable_mosaic.version = 11 : i64} {
  func.func @_conv_pool_relu_kernel(%arg0: i32, %arg1: memref<4x144x25xf32, #tpu.memory_space<vmem>>, %arg2: memref<25x128xf32, #tpu.memory_space<vmem>>, %arg3: memref<1x128xf32, #tpu.memory_space<vmem>>, %arg4: memref<144x128xf32, #tpu.memory_space<vmem>>) attributes {dimension_semantics = [#tpu.dimension_semantics<parallel>], iteration_bounds = array<i64: 2>, scalar_prefetch = 0 : i64, scratch_operands = 0 : i64, tpu.core_type = #tpu.core_type<tc>, window_params = [{transform_indices = @transform_0, window_bounds = array<i64: 4, 144, 25>}, {pipeline_mode = #tpu.pipeline_mode<synchronous>, transform_indices = @transform_1, window_bounds = array<i64: 25, 128>}, {pipeline_mode = #tpu.pipeline_mode<synchronous>, transform_indices = @transform_2, window_bounds = array<i64: 1, 128>}, {transform_indices = @transform_3, window_bounds = array<i64: 144, 128>}]} {
    %c0 = arith.constant 0 : index
    %c0_0 = arith.constant 0 : index
    %0 = vector.load %arg2[%c0, %c0_0] : memref<25x128xf32, #tpu.memory_space<vmem>>, vector<25x128xf32>
    %c0_1 = arith.constant 0 : index
    %c0_2 = arith.constant 0 : index
    %c0_3 = arith.constant 0 : index
    %1 = vector.load %arg1[%c0_1, %c0_2, %c0_3] : memref<4x144x25xf32, #tpu.memory_space<vmem>>, vector<1x144x25xf32>
    %2 = vector.shape_cast %1 : vector<1x144x25xf32> to vector<144x25xf32>
    %cst = arith.constant dense<0.000000e+00> : vector<144x128xf32>
    %3 = tpu.matmul %2, %0, %cst {dimension_numbers = #tpu.dot_dimension_numbers<[1], [0], [0], [1], [0, 0, 1, 1], [], []>} : vector<144x25xf32>, vector<25x128xf32>, vector<144x128xf32> -> vector<144x128xf32>
    %c1 = arith.constant 1 : index
    %c0_4 = arith.constant 0 : index
    %c0_5 = arith.constant 0 : index
    %4 = vector.load %arg1[%c1, %c0_4, %c0_5] : memref<4x144x25xf32, #tpu.memory_space<vmem>>, vector<1x144x25xf32>
    %5 = vector.shape_cast %4 : vector<1x144x25xf32> to vector<144x25xf32>
    %cst_6 = arith.constant dense<0.000000e+00> : vector<144x128xf32>
    %6 = tpu.matmul %5, %0, %cst_6 {dimension_numbers = #tpu.dot_dimension_numbers<[1], [0], [0], [1], [0, 0, 1, 1], [], []>} : vector<144x25xf32>, vector<25x128xf32>, vector<144x128xf32> -> vector<144x128xf32>
    %c2 = arith.constant 2 : index
    %c0_7 = arith.constant 0 : index
    %c0_8 = arith.constant 0 : index
    %7 = vector.load %arg1[%c2, %c0_7, %c0_8] : memref<4x144x25xf32, #tpu.memory_space<vmem>>, vector<1x144x25xf32>
    %8 = vector.shape_cast %7 : vector<1x144x25xf32> to vector<144x25xf32>
    %cst_9 = arith.constant dense<0.000000e+00> : vector<144x128xf32>
    %9 = tpu.matmul %8, %0, %cst_9 {dimension_numbers = #tpu.dot_dimension_numbers<[1], [0], [0], [1], [0, 0, 1, 1], [], []>} : vector<144x25xf32>, vector<25x128xf32>, vector<144x128xf32> -> vector<144x128xf32>
    %c3 = arith.constant 3 : index
    %c0_10 = arith.constant 0 : index
    %c0_11 = arith.constant 0 : index
    %10 = vector.load %arg1[%c3, %c0_10, %c0_11] : memref<4x144x25xf32, #tpu.memory_space<vmem>>, vector<1x144x25xf32>
    %11 = vector.shape_cast %10 : vector<1x144x25xf32> to vector<144x25xf32>
    %cst_12 = arith.constant dense<0.000000e+00> : vector<144x128xf32>
    %12 = tpu.matmul %11, %0, %cst_12 {dimension_numbers = #tpu.dot_dimension_numbers<[1], [0], [0], [1], [0, 0, 1, 1], [], []>} : vector<144x25xf32>, vector<25x128xf32>, vector<144x128xf32> -> vector<144x128xf32>
    %13 = arith.maximumf %3, %6 : vector<144x128xf32>
    %14 = arith.maximumf %9, %12 : vector<144x128xf32>
    %15 = arith.maximumf %13, %14 : vector<144x128xf32>
    %c0_13 = arith.constant 0 : index
    %c0_14 = arith.constant 0 : index
    %16 = vector.load %arg3[%c0_13, %c0_14] : memref<1x128xf32, #tpu.memory_space<vmem>>, vector<1x128xf32>
    %17 = vector.broadcast %16 : vector<1x128xf32> to vector<144x128xf32>
    %18 = arith.addf %15, %17 : vector<144x128xf32>
    %cst_15 = arith.constant 0.000000e+00 : f32
    %19 = vector.broadcast %cst_15 : f32 to vector<144x128xf32>
    %20 = arith.maximumf %18, %19 : vector<144x128xf32>
    %c0_16 = arith.constant 0 : index
    %c0_17 = arith.constant 0 : index
    %21 = vector.load %arg4[%c0_16, %c0_17] : memref<144x128xf32, #tpu.memory_space<vmem>>, vector<144x128xf32>
    tpu.vector_store %arg4[%c0_16, %c0_17], %20 {strides = array<i32>} : memref<144x128xf32, #tpu.memory_space<vmem>>, vector<144x128xf32>,
    return
  }
  func.func @transform_0(%arg0: i32) -> (i32, i32, i32) {
    %c0_i32 = arith.constant 0 : i32
    %c0_i32_0 = arith.constant 0 : i32
    %c0_i32_1 = arith.constant 0 : i32
    return %c0_i32, %arg0, %c0_i32_0 : i32, i32, i32
  }
  func.func @transform_1(%arg0: i32) -> (i32, i32) {
    %c0_i32 = arith.constant 0 : i32
    %c0_i32_0 = arith.constant 0 : i32
    %c0_i32_1 = arith.constant 0 : i32
    return %c0_i32, %c0_i32_0 : i32, i32
  }
  func.func @transform_2(%arg0: i32) -> (i32, i32) {
    %c0_i32 = arith.constant 0 : i32
    %c0_i32_0 = arith.constant 0 : i32
    %c0_i32_1 = arith.constant 0 : i32
    return %c0_i32, %c0_i32_0 : i32, i32
  }
  func.func @transform_3(%arg0: i32) -> (i32, i32) {
    %c0_i32 = arith.constant 0 : i32
    %c0_i32_0 = arith.constant 0 : i32
    return %arg0, %c0_i32 : i32, i32
  }
}

module attributes {stable_mosaic.version = 11 : i64} {
  func.func @_conv2_fc_head_kernel(%arg0: i32, %arg1: memref<128x250xf32, #tpu.memory_space<vmem>>, %arg2: memref<250x128xf32, #tpu.memory_space<vmem>>, %arg3: memref<1x128xf32, #tpu.memory_space<vmem>>, %arg4: memref<16x128x128xf32, #tpu.memory_space<vmem>>, %arg5: memref<1x128xf32, #tpu.memory_space<vmem>>, %arg6: memref<128x128xf32, #tpu.memory_space<vmem>>, %arg7: memref<1x128xf32, #tpu.memory_space<vmem>>, %arg8: memref<2x128xf32, #tpu.memory_space<vmem>>) attributes {dimension_semantics = [#tpu.dimension_semantics<arbitrary>], iteration_bounds = array<i64: 1>, scalar_prefetch = 0 : i64, scratch_operands = 0 : i64, tpu.core_type = #tpu.core_type<tc>, window_params = [{pipeline_mode = #tpu.pipeline_mode<synchronous>, transform_indices = @transform_0, window_bounds = array<i64: 128, 250>}, {pipeline_mode = #tpu.pipeline_mode<synchronous>, transform_indices = @transform_1, window_bounds = array<i64: 250, 128>}, {pipeline_mode = #tpu.pipeline_mode<synchronous>, transform_indices = @transform_2, window_bounds = array<i64: 1, 128>}, {pipeline_mode = #tpu.pipeline_mode<synchronous>, transform_indices = @transform_3, window_bounds = array<i64: 16, 128, 128>}, {pipeline_mode = #tpu.pipeline_mode<synchronous>, transform_indices = @transform_4, window_bounds = array<i64: 1, 128>}, {pipeline_mode = #tpu.pipeline_mode<synchronous>, transform_indices = @transform_5, window_bounds = array<i64: 128, 128>}, {pipeline_mode = #tpu.pipeline_mode<synchronous>, transform_indices = @transform_6, window_bounds = array<i64: 1, 128>}, {pipeline_mode = #tpu.pipeline_mode<synchronous>, transform_indices = @transform_7, window_bounds = array<i64: 2, 128>}]} {
    %c0 = arith.constant 0 : index
    %c0_0 = arith.constant 0 : index
    %0 = vector.load %arg1[%c0, %c0_0] : memref<128x250xf32, #tpu.memory_space<vmem>>, vector<128x250xf32>
    %c0_1 = arith.constant 0 : index
    %c0_2 = arith.constant 0 : index
    %1 = vector.load %arg2[%c0_1, %c0_2] : memref<250x128xf32, #tpu.memory_space<vmem>>, vector<250x128xf32>
    %cst = arith.constant dense<0.000000e+00> : vector<128x128xf32>
    %2 = tpu.matmul %0, %1, %cst {dimension_numbers = #tpu.dot_dimension_numbers<[1], [0], [0], [1], [0, 0, 1, 1], [], []>} : vector<128x250xf32>, vector<250x128xf32>, vector<128x128xf32> -> vector<128x128xf32>
    %3 = vector.extract_strided_slice %2 {offsets = [0, 0], sizes = [32, 128], strides = [1, 1]} : vector<128x128xf32> to vector<32x128xf32>
    %4 = vector.extract_strided_slice %2 {offsets = [32, 0], sizes = [32, 128], strides = [1, 1]} : vector<128x128xf32> to vector<32x128xf32>
    %5 = arith.maximumf %3, %4 : vector<32x128xf32>
    %6 = vector.extract_strided_slice %2 {offsets = [64, 0], sizes = [32, 128], strides = [1, 1]} : vector<128x128xf32> to vector<32x128xf32>
    %7 = vector.extract_strided_slice %2 {offsets = [96, 0], sizes = [32, 128], strides = [1, 1]} : vector<128x128xf32> to vector<32x128xf32>
    %8 = arith.maximumf %6, %7 : vector<32x128xf32>
    %9 = arith.maximumf %5, %8 : vector<32x128xf32>
    %c0_3 = arith.constant 0 : index
    %c0_4 = arith.constant 0 : index
    %10 = vector.load %arg3[%c0_3, %c0_4] : memref<1x128xf32, #tpu.memory_space<vmem>>, vector<1x128xf32>
    %11 = vector.broadcast %10 : vector<1x128xf32> to vector<32x128xf32>
    %12 = arith.addf %9, %11 : vector<32x128xf32>
    %cst_5 = arith.constant 0.000000e+00 : f32
    %13 = vector.broadcast %cst_5 : f32 to vector<32x128xf32>
    %14 = arith.maximumf %12, %13 : vector<32x128xf32>
    %cst_6 = arith.constant 0.000000e+00 : f32
    %15 = vector.broadcast %cst_6 : f32 to vector<2x128xf32>
    %16 = vector.extract_strided_slice %14 {offsets = [0, 0], sizes = [2, 128], strides = [1, 1]} : vector<32x128xf32> to vector<2x128xf32>
    %c0_7 = arith.constant 0 : index
    %c0_8 = arith.constant 0 : index
    %c0_9 = arith.constant 0 : index
    %17 = vector.load %arg4[%c0_7, %c0_8, %c0_9] : memref<16x128x128xf32, #tpu.memory_space<vmem>>, vector<1x128x128xf32>
    %18 = vector.shape_cast %17 : vector<1x128x128xf32> to vector<128x128xf32>
    %cst_10 = arith.constant dense<0.000000e+00> : vector<2x128xf32>
    %19 = tpu.matmul %16, %18, %cst_10 {dimension_numbers = #tpu.dot_dimension_numbers<[1], [0], [0], [1], [0, 0, 1, 1], [], []>} : vector<2x128xf32>, vector<128x128xf32>, vector<2x128xf32> -> vector<2x128xf32>
    %20 = arith.addf %15, %19 : vector<2x128xf32>
    %21 = vector.extract_strided_slice %14 {offsets = [2, 0], sizes = [2, 128], strides = [1, 1]} : vector<32x128xf32> to vector<2x128xf32>
    %c1 = arith.constant 1 : index
    %c0_11 = arith.constant 0 : index
    %c0_12 = arith.constant 0 : index
    %22 = vector.load %arg4[%c1, %c0_11, %c0_12] : memref<16x128x128xf32, #tpu.memory_space<vmem>>, vector<1x128x128xf32>
    %23 = vector.shape_cast %22 : vector<1x128x128xf32> to vector<128x128xf32>
    %cst_13 = arith.constant dense<0.000000e+00> : vector<2x128xf32>
    %24 = tpu.matmul %21, %23, %cst_13 {dimension_numbers = #tpu.dot_dimension_numbers<[1], [0], [0], [1], [0, 0, 1, 1], [], []>} : vector<2x128xf32>, vector<128x128xf32>, vector<2x128xf32> -> vector<2x128xf32>
    %25 = arith.addf %20, %24 : vector<2x128xf32>
    %26 = vector.extract_strided_slice %14 {offsets = [4, 0], sizes = [2, 128], strides = [1, 1]} : vector<32x128xf32> to vector<2x128xf32>
    %c2 = arith.constant 2 : index
    %c0_14 = arith.constant 0 : index
    %c0_15 = arith.constant 0 : index
    %27 = vector.load %arg4[%c2, %c0_14, %c0_15] : memref<16x128x128xf32, #tpu.memory_space<vmem>>, vector<1x128x128xf32>
    %28 = vector.shape_cast %27 : vector<1x128x128xf32> to vector<128x128xf32>
    %cst_16 = arith.constant dense<0.000000e+00> : vector<2x128xf32>
    %29 = tpu.matmul %26, %28, %cst_16 {dimension_numbers = #tpu.dot_dimension_numbers<[1], [0], [0], [1], [0, 0, 1, 1], [], []>} : vector<2x128xf32>, vector<128x128xf32>, vector<2x128xf32> -> vector<2x128xf32>
    %30 = arith.addf %25, %29 : vector<2x128xf32>
    %31 = vector.extract_strided_slice %14 {offsets = [6, 0], sizes = [2, 128], strides = [1, 1]} : vector<32x128xf32> to vector<2x128xf32>
    %c3 = arith.constant 3 : index
    %c0_17 = arith.constant 0 : index
    %c0_18 = arith.constant 0 : index
    %32 = vector.load %arg4[%c3, %c0_17, %c0_18] : memref<16x128x128xf32, #tpu.memory_space<vmem>>, vector<1x128x128xf32>
    %33 = vector.shape_cast %32 : vector<1x128x128xf32> to vector<128x128xf32>
    %cst_19 = arith.constant dense<0.000000e+00> : vector<2x128xf32>
    %34 = tpu.matmul %31, %33, %cst_19 {dimension_numbers = #tpu.dot_dimension_numbers<[1], [0], [0], [1], [0, 0, 1, 1], [], []>} : vector<2x128xf32>, vector<128x128xf32>, vector<2x128xf32> -> vector<2x128xf32>
    %35 = arith.addf %30, %34 : vector<2x128xf32>
    %36 = vector.extract_strided_slice %14 {offsets = [8, 0], sizes = [2, 128], strides = [1, 1]} : vector<32x128xf32> to vector<2x128xf32>
    %c4 = arith.constant 4 : index
    %c0_20 = arith.constant 0 : index
    %c0_21 = arith.constant 0 : index
    %37 = vector.load %arg4[%c4, %c0_20, %c0_21] : memref<16x128x128xf32, #tpu.memory_space<vmem>>, vector<1x128x128xf32>
    %38 = vector.shape_cast %37 : vector<1x128x128xf32> to vector<128x128xf32>
    %cst_22 = arith.constant dense<0.000000e+00> : vector<2x128xf32>
    %39 = tpu.matmul %36, %38, %cst_22 {dimension_numbers = #tpu.dot_dimension_numbers<[1], [0], [0], [1], [0, 0, 1, 1], [], []>} : vector<2x128xf32>, vector<128x128xf32>, vector<2x128xf32> -> vector<2x128xf32>
    %40 = arith.addf %35, %39 : vector<2x128xf32>
    %41 = vector.extract_strided_slice %14 {offsets = [10, 0], sizes = [2, 128], strides = [1, 1]} : vector<32x128xf32> to vector<2x128xf32>
    %c5 = arith.constant 5 : index
    %c0_23 = arith.constant 0 : index
    %c0_24 = arith.constant 0 : index
    %42 = vector.load %arg4[%c5, %c0_23, %c0_24] : memref<16x128x128xf32, #tpu.memory_space<vmem>>, vector<1x128x128xf32>
    %43 = vector.shape_cast %42 : vector<1x128x128xf32> to vector<128x128xf32>
    %cst_25 = arith.constant dense<0.000000e+00> : vector<2x128xf32>
    %44 = tpu.matmul %41, %43, %cst_25 {dimension_numbers = #tpu.dot_dimension_numbers<[1], [0], [0], [1], [0, 0, 1, 1], [], []>} : vector<2x128xf32>, vector<128x128xf32>, vector<2x128xf32> -> vector<2x128xf32>
    %45 = arith.addf %40, %44 : vector<2x128xf32>
    %46 = vector.extract_strided_slice %14 {offsets = [12, 0], sizes = [2, 128], strides = [1, 1]} : vector<32x128xf32> to vector<2x128xf32>
    %c6 = arith.constant 6 : index
    %c0_26 = arith.constant 0 : index
    %c0_27 = arith.constant 0 : index
    %47 = vector.load %arg4[%c6, %c0_26, %c0_27] : memref<16x128x128xf32, #tpu.memory_space<vmem>>, vector<1x128x128xf32>
    %48 = vector.shape_cast %47 : vector<1x128x128xf32> to vector<128x128xf32>
    %cst_28 = arith.constant dense<0.000000e+00> : vector<2x128xf32>
    %49 = tpu.matmul %46, %48, %cst_28 {dimension_numbers = #tpu.dot_dimension_numbers<[1], [0], [0], [1], [0, 0, 1, 1], [], []>} : vector<2x128xf32>, vector<128x128xf32>, vector<2x128xf32> -> vector<2x128xf32>
    %50 = arith.addf %45, %49 : vector<2x128xf32>
    %51 = vector.extract_strided_slice %14 {offsets = [14, 0], sizes = [2, 128], strides = [1, 1]} : vector<32x128xf32> to vector<2x128xf32>
    %c7 = arith.constant 7 : index
    %c0_29 = arith.constant 0 : index
    %c0_30 = arith.constant 0 : index
    %52 = vector.load %arg4[%c7, %c0_29, %c0_30] : memref<16x128x128xf32, #tpu.memory_space<vmem>>, vector<1x128x128xf32>
    %53 = vector.shape_cast %52 : vector<1x128x128xf32> to vector<128x128xf32>
    %cst_31 = arith.constant dense<0.000000e+00> : vector<2x128xf32>
    %54 = tpu.matmul %51, %53, %cst_31 {dimension_numbers = #tpu.dot_dimension_numbers<[1], [0], [0], [1], [0, 0, 1, 1], [], []>} : vector<2x128xf32>, vector<128x128xf32>, vector<2x128xf32> -> vector<2x128xf32>
    %55 = arith.addf %50, %54 : vector<2x128xf32>
    %56 = vector.extract_strided_slice %14 {offsets = [16, 0], sizes = [2, 128], strides = [1, 1]} : vector<32x128xf32> to vector<2x128xf32>
    %c8 = arith.constant 8 : index
    %c0_32 = arith.constant 0 : index
    %c0_33 = arith.constant 0 : index
    %57 = vector.load %arg4[%c8, %c0_32, %c0_33] : memref<16x128x128xf32, #tpu.memory_space<vmem>>, vector<1x128x128xf32>
    %58 = vector.shape_cast %57 : vector<1x128x128xf32> to vector<128x128xf32>
    %cst_34 = arith.constant dense<0.000000e+00> : vector<2x128xf32>
    %59 = tpu.matmul %56, %58, %cst_34 {dimension_numbers = #tpu.dot_dimension_numbers<[1], [0], [0], [1], [0, 0, 1, 1], [], []>} : vector<2x128xf32>, vector<128x128xf32>, vector<2x128xf32> -> vector<2x128xf32>
    %60 = arith.addf %55, %59 : vector<2x128xf32>
    %61 = vector.extract_strided_slice %14 {offsets = [18, 0], sizes = [2, 128], strides = [1, 1]} : vector<32x128xf32> to vector<2x128xf32>
    %c9 = arith.constant 9 : index
    %c0_35 = arith.constant 0 : index
    %c0_36 = arith.constant 0 : index
    %62 = vector.load %arg4[%c9, %c0_35, %c0_36] : memref<16x128x128xf32, #tpu.memory_space<vmem>>, vector<1x128x128xf32>
    %63 = vector.shape_cast %62 : vector<1x128x128xf32> to vector<128x128xf32>
    %cst_37 = arith.constant dense<0.000000e+00> : vector<2x128xf32>
    %64 = tpu.matmul %61, %63, %cst_37 {dimension_numbers = #tpu.dot_dimension_numbers<[1], [0], [0], [1], [0, 0, 1, 1], [], []>} : vector<2x128xf32>, vector<128x128xf32>, vector<2x128xf32> -> vector<2x128xf32>
    %65 = arith.addf %60, %64 : vector<2x128xf32>
    %66 = vector.extract_strided_slice %14 {offsets = [20, 0], sizes = [2, 128], strides = [1, 1]} : vector<32x128xf32> to vector<2x128xf32>
    %c10 = arith.constant 10 : index
    %c0_38 = arith.constant 0 : index
    %c0_39 = arith.constant 0 : index
    %67 = vector.load %arg4[%c10, %c0_38, %c0_39] : memref<16x128x128xf32, #tpu.memory_space<vmem>>, vector<1x128x128xf32>
    %68 = vector.shape_cast %67 : vector<1x128x128xf32> to vector<128x128xf32>
    %cst_40 = arith.constant dense<0.000000e+00> : vector<2x128xf32>
    %69 = tpu.matmul %66, %68, %cst_40 {dimension_numbers = #tpu.dot_dimension_numbers<[1], [0], [0], [1], [0, 0, 1, 1], [], []>} : vector<2x128xf32>, vector<128x128xf32>, vector<2x128xf32> -> vector<2x128xf32>
    %70 = arith.addf %65, %69 : vector<2x128xf32>
    %71 = vector.extract_strided_slice %14 {offsets = [22, 0], sizes = [2, 128], strides = [1, 1]} : vector<32x128xf32> to vector<2x128xf32>
    %c11 = arith.constant 11 : index
    %c0_41 = arith.constant 0 : index
    %c0_42 = arith.constant 0 : index
    %72 = vector.load %arg4[%c11, %c0_41, %c0_42] : memref<16x128x128xf32, #tpu.memory_space<vmem>>, vector<1x128x128xf32>
    %73 = vector.shape_cast %72 : vector<1x128x128xf32> to vector<128x128xf32>
    %cst_43 = arith.constant dense<0.000000e+00> : vector<2x128xf32>
    %74 = tpu.matmul %71, %73, %cst_43 {dimension_numbers = #tpu.dot_dimension_numbers<[1], [0], [0], [1], [0, 0, 1, 1], [], []>} : vector<2x128xf32>, vector<128x128xf32>, vector<2x128xf32> -> vector<2x128xf32>
    %75 = arith.addf %70, %74 : vector<2x128xf32>
    %76 = vector.extract_strided_slice %14 {offsets = [24, 0], sizes = [2, 128], strides = [1, 1]} : vector<32x128xf32> to vector<2x128xf32>
    %c12 = arith.constant 12 : index
    %c0_44 = arith.constant 0 : index
    %c0_45 = arith.constant 0 : index
    %77 = vector.load %arg4[%c12, %c0_44, %c0_45] : memref<16x128x128xf32, #tpu.memory_space<vmem>>, vector<1x128x128xf32>
    %78 = vector.shape_cast %77 : vector<1x128x128xf32> to vector<128x128xf32>
    %cst_46 = arith.constant dense<0.000000e+00> : vector<2x128xf32>
    %79 = tpu.matmul %76, %78, %cst_46 {dimension_numbers = #tpu.dot_dimension_numbers<[1], [0], [0], [1], [0, 0, 1, 1], [], []>} : vector<2x128xf32>, vector<128x128xf32>, vector<2x128xf32> -> vector<2x128xf32>
    %80 = arith.addf %75, %79 : vector<2x128xf32>
    %81 = vector.extract_strided_slice %14 {offsets = [26, 0], sizes = [2, 128], strides = [1, 1]} : vector<32x128xf32> to vector<2x128xf32>
    %c13 = arith.constant 13 : index
    %c0_47 = arith.constant 0 : index
    %c0_48 = arith.constant 0 : index
    %82 = vector.load %arg4[%c13, %c0_47, %c0_48] : memref<16x128x128xf32, #tpu.memory_space<vmem>>, vector<1x128x128xf32>
    %83 = vector.shape_cast %82 : vector<1x128x128xf32> to vector<128x128xf32>
    %cst_49 = arith.constant dense<0.000000e+00> : vector<2x128xf32>
    %84 = tpu.matmul %81, %83, %cst_49 {dimension_numbers = #tpu.dot_dimension_numbers<[1], [0], [0], [1], [0, 0, 1, 1], [], []>} : vector<2x128xf32>, vector<128x128xf32>, vector<2x128xf32> -> vector<2x128xf32>
    %85 = arith.addf %80, %84 : vector<2x128xf32>
    %86 = vector.extract_strided_slice %14 {offsets = [28, 0], sizes = [2, 128], strides = [1, 1]} : vector<32x128xf32> to vector<2x128xf32>
    %c14 = arith.constant 14 : index
    %c0_50 = arith.constant 0 : index
    %c0_51 = arith.constant 0 : index
    %87 = vector.load %arg4[%c14, %c0_50, %c0_51] : memref<16x128x128xf32, #tpu.memory_space<vmem>>, vector<1x128x128xf32>
    %88 = vector.shape_cast %87 : vector<1x128x128xf32> to vector<128x128xf32>
    %cst_52 = arith.constant dense<0.000000e+00> : vector<2x128xf32>
    %89 = tpu.matmul %86, %88, %cst_52 {dimension_numbers = #tpu.dot_dimension_numbers<[1], [0], [0], [1], [0, 0, 1, 1], [], []>} : vector<2x128xf32>, vector<128x128xf32>, vector<2x128xf32> -> vector<2x128xf32>
    %90 = arith.addf %85, %89 : vector<2x128xf32>
    %91 = vector.extract_strided_slice %14 {offsets = [30, 0], sizes = [2, 128], strides = [1, 1]} : vector<32x128xf32> to vector<2x128xf32>
    %c15 = arith.constant 15 : index
    %c0_53 = arith.constant 0 : index
    %c0_54 = arith.constant 0 : index
    %92 = vector.load %arg4[%c15, %c0_53, %c0_54] : memref<16x128x128xf32, #tpu.memory_space<vmem>>, vector<1x128x128xf32>
    %93 = vector.shape_cast %92 : vector<1x128x128xf32> to vector<128x128xf32>
    %cst_55 = arith.constant dense<0.000000e+00> : vector<2x128xf32>
    %94 = tpu.matmul %91, %93, %cst_55 {dimension_numbers = #tpu.dot_dimension_numbers<[1], [0], [0], [1], [0, 0, 1, 1], [], []>} : vector<2x128xf32>, vector<128x128xf32>, vector<2x128xf32> -> vector<2x128xf32>
    %95 = arith.addf %90, %94 : vector<2x128xf32>
    %c0_56 = arith.constant 0 : index
    %c0_57 = arith.constant 0 : index
    %96 = vector.load %arg5[%c0_56, %c0_57] : memref<1x128xf32, #tpu.memory_space<vmem>>, vector<1x128xf32>
    %97 = vector.broadcast %96 : vector<1x128xf32> to vector<2x128xf32>
    %98 = arith.addf %95, %97 : vector<2x128xf32>
    %cst_58 = arith.constant 0.000000e+00 : f32
    %99 = vector.broadcast %cst_58 : f32 to vector<2x128xf32>
    %100 = arith.maximumf %98, %99 : vector<2x128xf32>
    %c0_59 = arith.constant 0 : index
    %c0_60 = arith.constant 0 : index
    %101 = vector.load %arg6[%c0_59, %c0_60] : memref<128x128xf32, #tpu.memory_space<vmem>>, vector<128x128xf32>
    %cst_61 = arith.constant dense<0.000000e+00> : vector<2x128xf32>
    %102 = tpu.matmul %100, %101, %cst_61 {dimension_numbers = #tpu.dot_dimension_numbers<[1], [0], [0], [1], [0, 0, 1, 1], [], []>} : vector<2x128xf32>, vector<128x128xf32>, vector<2x128xf32> -> vector<2x128xf32>
    %c0_62 = arith.constant 0 : index
    %c0_63 = arith.constant 0 : index
    %103 = vector.load %arg7[%c0_62, %c0_63] : memref<1x128xf32, #tpu.memory_space<vmem>>, vector<1x128xf32>
    %104 = vector.broadcast %103 : vector<1x128xf32> to vector<2x128xf32>
    %105 = arith.addf %102, %104 : vector<2x128xf32>
    %cst_64 = arith.constant dense<0xFF800000> : vector<128xf32>
    %106 = vector.multi_reduction <maximumf>, %105, %cst_64 [0] : vector<2x128xf32> to vector<128xf32>
    %107 = vector.shape_cast %106 : vector<128xf32> to vector<1x128xf32>
    %108 = vector.broadcast %107 : vector<1x128xf32> to vector<2x128xf32>
    %109 = arith.subf %105, %108 : vector<2x128xf32>
    %110 = math.exp %109 : vector<2x128xf32>
    %cst_65 = arith.constant dense<0.000000e+00> : vector<128xf32>
    %111 = vector.multi_reduction <add>, %110, %cst_65 [0] : vector<2x128xf32> to vector<128xf32>
    %112 = vector.shape_cast %111 : vector<128xf32> to vector<1x128xf32>
    %113 = vector.broadcast %107 : vector<1x128xf32> to vector<2x128xf32>
    %114 = arith.subf %105, %113 : vector<2x128xf32>
    %115 = math.log %112 : vector<1x128xf32>
    %116 = vector.broadcast %115 : vector<1x128xf32> to vector<2x128xf32>
    %117 = arith.subf %114, %116 : vector<2x128xf32>
    %c0_66 = arith.constant 0 : index
    %c0_67 = arith.constant 0 : index
    %118 = vector.load %arg8[%c0_66, %c0_67] : memref<2x128xf32, #tpu.memory_space<vmem>>, vector<2x128xf32>
    tpu.vector_store %arg8[%c0_66, %c0_67], %117 {strides = array<i32>} : memref<2x128xf32, #tpu.memory_space<vmem>>, vector<2x128xf32>,
    return
  }
  func.func @transform_0(%arg0: i32) -> (i32, i32) {
    %c0_i32 = arith.constant 0 : i32
    %c0_i32_0 = arith.constant 0 : i32
    %c0_i32_1 = arith.constant 0 : i32
    return %c0_i32, %c0_i32_0 : i32, i32
  }
  func.func @transform_1(%arg0: i32) -> (i32, i32) {
    %c0_i32 = arith.constant 0 : i32
    %c0_i32_0 = arith.constant 0 : i32
    %c0_i32_1 = arith.constant 0 : i32
    return %c0_i32, %c0_i32_0 : i32, i32
  }
  func.func @transform_2(%arg0: i32) -> (i32, i32) {
    %c0_i32 = arith.constant 0 : i32
    %c0_i32_0 = arith.constant 0 : i32
    %c0_i32_1 = arith.constant 0 : i32
    return %c0_i32, %c0_i32_0 : i32, i32
  }
  func.func @transform_3(%arg0: i32) -> (i32, i32, i32) {
    %c0_i32 = arith.constant 0 : i32
    %c0_i32_0 = arith.constant 0 : i32
    %c0_i32_1 = arith.constant 0 : i32
    %c0_i32_2 = arith.constant 0 : i32
    return %c0_i32, %c0_i32_0, %c0_i32_1 : i32, i32, i32
  }
  func.func @transform_4(%arg0: i32) -> (i32, i32) {
    %c0_i32 = arith.constant 0 : i32
    %c0_i32_0 = arith.constant 0 : i32
    %c0_i32_1 = arith.constant 0 : i32
    return %c0_i32, %c0_i32_0 : i32, i32
  }
  func.func @transform_5(%arg0: i32) -> (i32, i32) {
    %c0_i32 = arith.constant 0 : i32
    %c0_i32_0 = arith.constant 0 : i32
    %c0_i32_1 = arith.constant 0 : i32
    return %c0_i32, %c0_i32_0 : i32, i32
  }
  func.func @transform_6(%arg0: i32) -> (i32, i32) {
    %c0_i32 = arith.constant 0 : i32
    %c0_i32_0 = arith.constant 0 : i32
    %c0_i32_1 = arith.constant 0 : i32
    return %c0_i32, %c0_i32_0 : i32, i32
  }
  func.func @transform_7(%arg0: i32) -> (i32, i32) {
    %c0_i32 = arith.constant 0 : i32
    %c0_i32_0 = arith.constant 0 : i32
    %c0_i32_1 = arith.constant 0 : i32
    return %c0_i32, %c0_i32_0 : i32, i32
  }
}

</mosaic_0001>

<bundles_post_ra>
// kernel: model_forward.2
= control target key start
LH: loop header
LB: loop body
LE: loop exit
PB: predicated region body
PF: predicated region fallthrough
CT: control target
= control target key end

     0   :  { %s1462_s12 = smov 0   ;;  %s1464_s13 = smov 0   ;;  %s1863_s0 = inlined_call_operand.vmem [shape: f32[4,288,25], index: 0, kind: input, shape index: {}]   ;;  %s1864_s1 = inlined_call_operand.vmem [shape: f32[25,128], index: 1, kind: input, shape index: {}]   ;;  %s1865_s2 = inlined_call_operand.vmem [shape: f32[1,128], index: 2, kind: input, shape index: {}]   ;;  %s1866_s3 = inlined_call_operand.vmem [shape: f32[288,128], index: 3, kind: output, shape index: {}]  }
   0x1   :  { %s1466_s14 = smov 0  }
   0x2 LB: > { %s1251_s15 = sadd.s32 4294967295, %s1440_s14   ;;  %s1479_s16 = sadd.s32 1, %s1440_s14   ;;  %s1440_s14 = sphi %s1466_s14, %s1869_s14   ;;  %s1436_s13 = sphi %s1464_s13, %s1868_s13   ;;  %s1432_s12 = sphi %s1462_s12, %s1867_s12  }
   0x3   : > { %s17_s17 = ssub.s32 %s1440_s14, %s1479_s16  ;;  %s20_s18 = sadd.s32 1, %s1436_s13 }
   0x4   : > { %p18_p0 = scmp.eq.s32.totalorder %s17_s17, 0  ;;  %p27_p1 = scmp.ne.s32.totalorder %s1436_s13, %s1432_s12 }
   0x5   : > { %p28_p2 = scmp.eq.s32.totalorder %s1440_s14, 0  ;;  %p1254_p4 = scmp.ge.s32.totalorder %s1440_s14, 2 }
   0x6   : > { %s1488_s19 = scalar_select %p18_p0, %s1436_s13, %s20_s18  }
   0x7   : > { %p29_p3 = por %p28_p2, %p27_p1  ;;  %127 = sbr.rel (%p1254_p4) target bundleno = 89 (0x59), region = 24 }
   0xc   : > { %130 = sbr.rel (!%p29_p3) target bundleno = 89 (0x59), region = 28  ;;  %s132_s20 = sand.u32 (%p29_p3), 1, %s1436_s13  }
   0xd   : > { %s1390_s21 = smul.u32 (%p29_p3), 144, %s1440_s14 }
   0xe   : > { %s1391_s22 = smul.u32 (%p29_p3), 576, %s132_s20 }
   0xf   : > { %s1496_s25 = scalar_lea.vmem (%p29_p3), %s1863_s0, %s1390_s21 }
  0x10   : > { %v308_v0 = vld [vmem:[%s1496_s25] sm:$0xff] (%p29_p3)  ;;  %v310_v1 = vld [vmem:[%s1496_s25 + $0x8] sm:$0xff] (%p29_p3)  ;;  %v312_v2 = vld [vmem:[%s1496_s25 + $0x10] sm:$0xff] (%p29_p3)  ;;  %s1501_s26 = scalar_lea.vmem (%p29_p3), [#allocation2], %s1391_s22 }
  0x11   : > { %309 = vst [vmem:[%s1501_s26] sm:$0xff] %v308_v0  ;;  %v314_v3 = vld [vmem:[%s1496_s25 + $0x18] sm:$0xff]  ;;  %v316_v4 = vld [vmem:[%s1496_s25 + $0x20] sm:$0xff]  ;;  %v318_v5 = vld [vmem:[%s1496_s25 + $0x28] sm:$0xff] }
  0x12   : > { %311 = vst [vmem:[%s1501_s26 + $0x8] sm:$0xff] %v310_v1  ;;  %v320_v6 = vld [vmem:[%s1496_s25 + $0x30] sm:$0xff]  ;;  %v322_v7 = vld [vmem:[%s1496_s25 + $0x38] sm:$0xff]  ;;  %v324_v8 = vld [vmem:[%s1496_s25 + $0x40] sm:$0xff] }
  0x13   : > { %313 = vst [vmem:[%s1501_s26 + $0x10] sm:$0xff] %v312_v2  ;;  %v326_v9 = vld [vmem:[%s1496_s25 + $0x48] sm:$0xff]  ;;  %v328_v10 = vld [vmem:[%s1496_s25 + $0x50] sm:$0xff]  ;;  %v330_v11 = vld [vmem:[%s1496_s25 + $0x58] sm:$0xff] }
  0x14   : > { %315 = vst [vmem:[%s1501_s26 + $0x18] sm:$0xff] %v314_v3  ;;  %v332_v12 = vld [vmem:[%s1496_s25 + $0x60] sm:$0xff]  ;;  %v334_v13 = vld [vmem:[%s1496_s25 + $0x68] sm:$0xff]  ;;  %v336_v14 = vld [vmem:[%s1496_s25 + $0x70] sm:$0xff] }
  0x15   : > { %317 = vst [vmem:[%s1501_s26 + $0x20] sm:$0xff] %v316_v4  ;;  %v338_v15 = vld [vmem:[%s1496_s25 + $0x78] sm:$0xff]  ;;  %v340_v16 = vld [vmem:[%s1496_s25 + $0x80] sm:$0xff]  ;;  %v342_v17 = vld [vmem:[%s1496_s25 + $0x88] sm:$0xff] }
  0x16   : > { %319 = vst [vmem:[%s1501_s26 + $0x28] sm:$0xff] %v318_v5  ;;  %v344_v18 = vld [vmem:[%s1496_s25 + $0x120] sm:$0xff]  ;;  %v346_v19 = vld [vmem:[%s1496_s25 + $0x128] sm:$0xff]  ;;  %v348_v20 = vld [vmem:[%s1496_s25 + $0x130] sm:$0xff] }
  0x17   : > { %321 = vst [vmem:[%s1501_s26 + $0x30] sm:$0xff] %v320_v6  ;;  %v350_v21 = vld [vmem:[%s1496_s25 + $0x138] sm:$0xff]  ;;  %v352_v22 = vld [vmem:[%s1496_s25 + $0x140] sm:$0xff]  ;;  %v354_v23 = vld [vmem:[%s1496_s25 + $0x148] sm:$0xff] }
  0x18   : > { %323 = vst [vmem:[%s1501_s26 + $0x38] sm:$0xff] %v322_v7  ;;  %v356_v24 = vld [vmem:[%s1496_s25 + $0x150] sm:$0xff]  ;;  %v358_v25 = vld [vmem:[%s1496_s25 + $0x158] sm:$0xff]  ;;  %v360_v26 = vld [vmem:[%s1496_s25 + $0x160] sm:$0xff] }
  0x19   : > { %325 = vst [vmem:[%s1501_s26 + $0x40] sm:$0xff] %v324_v8  ;;  %v362_v27 = vld [vmem:[%s1496_s25 + $0x168] sm:$0xff]  ;;  %v364_v28 = vld [vmem:[%s1496_s25 + $0x170] sm:$0xff]  ;;  %v366_v29 = vld [vmem:[%s1496_s25 + $0x178] sm:$0xff] }
  0x1a   : > { %327 = vst [vmem:[%s1501_s26 + $0x48] sm:$0xff] %v326_v9  ;;  %v368_v30 = vld [vmem:[%s1496_s25 + $0x180] sm:$0xff]  ;;  %v370_v31 = vld [vmem:[%s1496_s25 + $0x188] sm:$0xff]  ;;  %v372_v32 = vld [vmem:[%s1496_s25 + $0x190] sm:$0xff] }
  0x1b   : > { %329 = vst [vmem:[%s1501_s26 + $0x50] sm:$0xff] %v328_v10  ;;  %v374_v33 = vld [vmem:[%s1496_s25 + $0x198] sm:$0xff]  ;;  %v376_v34 = vld [vmem:[%s1496_s25 + $0x1a0] sm:$0xff]  ;;  %v378_v35 = vld [vmem:[%s1496_s25 + $0x1a8] sm:$0xff] }
  0x1c   : > { %331 = vst [vmem:[%s1501_s26 + $0x58] sm:$0xff] %v330_v11  ;;  %v380_v36 = vld [vmem:[%s1496_s25 + $0x240] sm:$0xff]  ;;  %v382_v37 = vld [vmem:[%s1496_s25 + $0x248] sm:$0xff]  ;;  %v384_v38 = vld [vmem:[%s1496_s25 + $0x250] sm:$0xff] }
  0x1d   : > { %333 = vst [vmem:[%s1501_s26 + $0x60] sm:$0xff] %v332_v12  ;;  %v386_v39 = vld [vmem:[%s1496_s25 + $0x258] sm:$0xff]  ;;  %v388_v40 = vld [vmem:[%s1496_s25 + $0x260] sm:$0xff]  ;;  %v390_v41 = vld [vmem:[%s1496_s25 + $0x268] sm:$0xff] }
  0x1e   : > { %335 = vst [vmem:[%s1501_s26 + $0x68] sm:$0xff] %v334_v13  ;;  %v392_v42 = vld [vmem:[%s1496_s25 + $0x270] sm:$0xff]  ;;  %v394_v43 = vld [vmem:[%s1496_s25 + $0x278] sm:$0xff]  ;;  %v396_v44 = vld [vmem:[%s1496_s25 + $0x280] sm:$0xff] }
  0x1f   : > { %337 = vst [vmem:[%s1501_s26 + $0x70] sm:$0xff] %v336_v14  ;;  %v398_v45 = vld [vmem:[%s1496_s25 + $0x288] sm:$0xff]  ;;  %v400_v46 = vld [vmem:[%s1496_s25 + $0x290] sm:$0xff]  ;;  %v402_v47 = vld [vmem:[%s1496_s25 + $0x298] sm:$0xff] }
  0x20   : > { %339 = vst [vmem:[%s1501_s26 + $0x78] sm:$0xff] %v338_v15  ;;  %v404_v48 = vld [vmem:[%s1496_s25 + $0x2a0] sm:$0xff]  ;;  %v406_v49 = vld [vmem:[%s1496_s25 + $0x2a8] sm:$0xff]  ;;  %v408_v50 = vld [vmem:[%s1496_s25 + $0x2b0] sm:$0xff] }
  0x21   : > { %341 = vst [vmem:[%s1501_s26 + $0x80] sm:$0xff] %v340_v16  ;;  %v410_v51 = vld [vmem:[%s1496_s25 + $0x2b8] sm:$0xff]  ;;  %v412_v52 = vld [vmem:[%s1496_s25 + $0x2c0] sm:$0xff]  ;;  %v414_v53 = vld [vmem:[%s1496_s25 + $0x2c8] sm:$0xff] }
  0x22   : > { %343 = vst [vmem:[%s1501_s26 + $0x88] sm:$0xff] %v342_v17  ;;  %v416_v54 = vld [vmem:[%s1496_s25 + $0x360] sm:$0xff]  ;;  %v418_v55 = vld [vmem:[%s1496_s25 + $0x368] sm:$0xff]  ;;  %v420_v56 = vld [vmem:[%s1496_s25 + $0x370] sm:$0xff] }
  0x23   : > { %345 = vst [vmem:[%s1501_s26 + $0x90] sm:$0xff] %v344_v18  ;;  %v422_v57 = vld [vmem:[%s1496_s25 + $0x378] sm:$0xff]  ;;  %v424_v58 = vld [vmem:[%s1496_s25 + $0x380] sm:$0xff]  ;;  %v426_v59 = vld [vmem:[%s1496_s25 + $0x388] sm:$0xff] }
  0x24   : > { %347 = vst [vmem:[%s1501_s26 + $0x98] sm:$0xff] %v346_v19  ;;  %v428_v60 = vld [vmem:[%s1496_s25 + $0x390] sm:$0xff]  ;;  %v430_v61 = vld [vmem:[%s1496_s25 + $0x398] sm:$0xff]  ;;  %v432_v62 = vld [vmem:[%s1496_s25 + $0x3a0] sm:$0xff] }
  0x25   : > { %349 = vst [vmem:[%s1501_s26 + $0xa0] sm:$0xff] %v348_v20  ;;  %v434_v63 = vld [vmem:[%s1496_s25 + $0x3a8] sm:$0xff]  ;;  %v436_v0 = vld [vmem:[%s1496_s25 + $0x3b0] sm:$0xff]  ;;  %v438_v1 = vld [vmem:[%s1496_s25 + $0x3b8] sm:$0xff] }
  0x26   : > { %351 = vst [vmem:[%s1501_s26 + $0xa8] sm:$0xff] %v350_v21  ;;  %v440_v2 = vld [vmem:[%s1496_s25 + $0x3c0] sm:$0xff]  ;;  %v442_v3 = vld [vmem:[%s1496_s25 + $0x3c8] sm:$0xff]  ;;  %v444_v4 = vld [vmem:[%s1496_s25 + $0x3d0] sm:$0xff] }
  0x27   : > { %353 = vst [vmem:[%s1501_s26 + $0xb0] sm:$0xff] %v352_v22  ;;  %v446_v5 = vld [vmem:[%s1496_s25 + $0x3d8] sm:$0xff]  ;;  %v448_v6 = vld [vmem:[%s1496_s25 + $0x3e0] sm:$0xff]  ;;  %v450_v7 = vld [vmem:[%s1496_s25 + $0x3e8] sm:$0xff] }
  0x28   : > { %355 = vst [vmem:[%s1501_s26 + $0xb8] sm:$0xff] %v354_v23 }
  0x29   : > { %357 = vst [vmem:[%s1501_s26 + $0xc0] sm:$0xff] %v356_v24 }
  0x2a   : > { %359 = vst [vmem:[%s1501_s26 + $0xc8] sm:$0xff] %v358_v25 }
  0x2b   : > { %361 = vst [vmem:[%s1501_s26 + $0xd0] sm:$0xff] %v360_v26 }
  0x2c   : > { %363 = vst [vmem:[%s1501_s26 + $0xd8] sm:$0xff] %v362_v27 }
  0x2d   : > { %365 = vst [vmem:[%s1501_s26 + $0xe0] sm:$0xff] %v364_v28 }
  0x2e   : > { %367 = vst [vmem:[%s1501_s26 + $0xe8] sm:$0xff] %v366_v29 }
  0x2f   : > { %369 = vst [vmem:[%s1501_s26 + $0xf0] sm:$0xff] %v368_v30 }
  0x30   : > { %371 = vst [vmem:[%s1501_s26 + $0xf8] sm:$0xff] %v370_v31 }
  0x31   : > { %373 = vst [vmem:[%s1501_s26 + $0x100] sm:$0xff] %v372_v32 }
  0x32   : > { %375 = vst [vmem:[%s1501_s26 + $0x108] sm:$0xff] %v374_v33 }
  0x33   : > { %377 = vst [vmem:[%s1501_s26 + $0x110] sm:$0xff] %v376_v34 }
  0x34   : > { %379 = vst [vmem:[%s1501_s26 + $0x118] sm:$0xff] %v378_v35 }
  0x35   : > { %381 = vst [vmem:[%s1501_s26 + $0x120] sm:$0xff] %v380_v36 }
  0x36   : > { %383 = vst [vmem:[%s1501_s26 + $0x128] sm:$0xff] %v382_v37 }
  0x37   : > { %385 = vst [vmem:[%s1501_s26 + $0x130] sm:$0xff] %v384_v38 }
  0x38   : > { %387 = vst [vmem:[%s1501_s26 + $0x138] sm:$0xff] %v386_v39 }
  0x39   : > { %389 = vst [vmem:[%s1501_s26 + $0x140] sm:$0xff] %v388_v40 }
  0x3a   : > { %391 = vst [vmem:[%s1501_s26 + $0x148] sm:$0xff] %v390_v41 }
  0x3b   : > { %393 = vst [vmem:[%s1501_s26 + $0x150] sm:$0xff] %v392_v42 }
  0x3c   : > { %395 = vst [vmem:[%s1501_s26 + $0x158] sm:$0xff] %v394_v43 }
  0x3d   : > { %397 = vst [vmem:[%s1501_s26 + $0x160] sm:$0xff] %v396_v44 }
  0x3e   : > { %399 = vst [vmem:[%s1501_s26 + $0x168] sm:$0xff] %v398_v45 }
  0x3f   : > { %401 = vst [vmem:[%s1501_s26 + $0x170] sm:$0xff] %v400_v46 }
  0x40   : > { %403 = vst [vmem:[%s1501_s26 + $0x178] sm:$0xff] %v402_v47 }
  0x41   : > { %405 = vst [vmem:[%s1501_s26 + $0x180] sm:$0xff] %v404_v48 }
  0x42   : > { %407 = vst [vmem:[%s1501_s26 + $0x188] sm:$0xff] %v406_v49 }
  0x43   : > { %409 = vst [vmem:[%s1501_s26 + $0x190] sm:$0xff] %v408_v50 }
  0x44   : > { %411 = vst [vmem:[%s1501_s26 + $0x198] sm:$0xff] %v410_v51 }
  0x45   : > { %413 = vst [vmem:[%s1501_s26 + $0x1a0] sm:$0xff] %v412_v52 }
  0x46   : > { %415 = vst [vmem:[%s1501_s26 + $0x1a8] sm:$0xff] %v414_v53 }
  0x47   : > { %417 = vst [vmem:[%s1501_s26 + $0x1b0] sm:$0xff] %v416_v54 }
  0x48   : > { %419 = vst [vmem:[%s1501_s26 + $0x1b8] sm:$0xff] %v418_v55 }
  0x49   : > { %421 = vst [vmem:[%s1501_s26 + $0x1c0] sm:$0xff] %v420_v56 }
  0x4a   : > { %423 = vst [vmem:[%s1501_s26 + $0x1c8] sm:$0xff] %v422_v57 }
  0x4b   : > { %425 = vst [vmem:[%s1501_s26 + $0x1d0] sm:$0xff] %v424_v58 }
  0x4c   : > { %427 = vst [vmem:[%s1501_s26 + $0x1d8] sm:$0xff] %v426_v59 }
  0x4d   : > { %429 = vst [vmem:[%s1501_s26 + $0x1e0] sm:$0xff] %v428_v60 }
  0x4e   : > { %431 = vst [vmem:[%s1501_s26 + $0x1e8] sm:$0xff] %v430_v61 }
  0x4f   : > { %433 = vst [vmem:[%s1501_s26 + $0x1f0] sm:$0xff] %v432_v62 }
  0x50   : > { %435 = vst [vmem:[%s1501_s26 + $0x1f8] sm:$0xff] %v434_v63 }
  0x51   : > { %437 = vst [vmem:[%s1501_s26 + $0x200] sm:$0xff] %v436_v0 }
  0x52   : > { %439 = vst [vmem:[%s1501_s26 + $0x208] sm:$0xff] %v438_v1 }
  0x53   : > { %441 = vst [vmem:[%s1501_s26 + $0x210] sm:$0xff] %v440_v2 }
  0x54   : > { %443 = vst [vmem:[%s1501_s26 + $0x218] sm:$0xff] %v442_v3 }
  0x55   : > { %445 = vst [vmem:[%s1501_s26 + $0x220] sm:$0xff] %v444_v4 }
  0x56   : > { %447 = vst [vmem:[%s1501_s26 + $0x228] sm:$0xff] %v446_v5 }
  0x57   : > { %449 = vst [vmem:[%s1501_s26 + $0x230] sm:$0xff] %v448_v6 }
  0x58   : > { %451 = vst [vmem:[%s1501_s26 + $0x238] sm:$0xff] %v450_v7 }
  0x59 PF: > { %p1256_p5 = scmp.ge.s32.totalorder %s1440_s14, 1  ;;  %p456_p6 = scmp.lt.s32.totalorder %s1440_s14, 3 }
  0x5b   : > { %p457_p7 = pnand %p1256_p5, %p456_p6 }
  0x5c   : > { %s463_s4 = sand.u32 (!%p457_p7), 1, %s1432_s12   ;;  %s487_s11 = smul.u32 (!%p457_p7), 18, %s1251_s15 }
  0x5d   : > { %460 = sbr.rel (%p457_p7) target bundleno = 383 (0x17f), region = 66 }
  0x5e   : > { %s1392_s5 = smul.u32 (!%p457_p7), 576, %s463_s4  ;;  %p488_p8 = scmp.lt.s32.totalorder (!%p457_p7), %s487_s11, 35 }
  0x60   : > { %s1659_s10 = scalar_lea.vmem (!%p457_p7), [#allocation2], %s1392_s5 }
  0x62   : > { %v496_v8 = vld [vmem:[%s1864_s1 + $0x18] sm:$0x1]  ;;  %vm570_vm0 = vcmask 1040384   ;;  %v495_v9 = vld [vmem:[%s1864_s1 + $0x10] sm:$0xff]  ;;  %v494_v10 = vld [vmem:[%s1864_s1 + $0x8] sm:$0xff]  ;;  %vm515_vm1 = vcmask 203776  }
  0x63   : > { %1332 = vmatpush.msk.msra.mxu2 %vm570_vm0, %v496_v8  ;;  %1369 = vmatpush.msk.msra.mxu3 %vm570_vm0, %v496_v8  ;;  %v493_v11 = vld [vmem:[%s1864_s1] sm:$0xff]  ;;  %v1351_v13 = vld [vmem:[%s1659_s10 + $0x1b0] sm:$0xff]  ;;  %v1315_v16 = vld [vmem:[%s1659_s10 + $0x128] sm:$0xff]  ;;  %s1871_s11 = smov (!%p488_p8, %s487_s11), 35 }
  0x64   : > { %1258 = vmatpush.msk.msra.mxu0 %vm570_vm0, %v496_v8  ;;  %1295 = vmatpush.msk.msra.mxu1 %vm570_vm0, %v496_v8  ;;  %v1314_v12 = vld [vmem:[%s1659_s10 + $0x120] sm:$0xff]  ;;  %v1277_v15 = vld [vmem:[%s1659_s10 + $0x90] sm:$0xff]  ;;  %v1352_v17 = vld [vmem:[%s1659_s10 + $0x1b8] sm:$0xff]  ;;  %s1257_s15 = sshll.u32 %s1871_s11, 3 }
  0x65   : > { %875 = vmatpush.msra.mxu2 %v495_v9  ;;  %1019 = vmatpush.msra.mxu3 %v495_v9  ;;  %v497_v14 = vld [vmem:[%s1659_s10] sm:$0xff]  ;;  %v498_v18 = vld [vmem:[%s1659_s10 + $0x8] sm:$0xff]  ;;  %v1278_v19 = vld [vmem:[%s1659_s10 + $0x98] sm:$0xff]  ;;  %s1814_s20 = scalar_lea.vmem %s1866_s3, %s1257_s15 }
  0x66   : > { %587 = vmatpush.msra.mxu0 %v495_v9  ;;  %731 = vmatpush.msra.mxu1 %v495_v9  ;;  %v1316_v20 = vld [vmem:[%s1659_s10 + $0x130] sm:$0xff]  ;;  %v1353_v21 = vld [vmem:[%s1659_s10 + $0x1c0] sm:$0xff]  ;;  %v1317_v24 = vld [vmem:[%s1659_s10 + $0x138] sm:$0xff] }
  0x67   : > { %876 = vmatpush.msra.mxu2 %v494_v10  ;;  %1020 = vmatpush.msra.mxu3 %v494_v10  ;;  %v499_v22 = vld [vmem:[%s1659_s10 + $0x10] sm:$0xff]  ;;  %v1279_v23 = vld [vmem:[%s1659_s10 + $0xa0] sm:$0xff]  ;;  %v1354_v25 = vld [vmem:[%s1659_s10 + $0x1c8] sm:$0xff] }
  0x68   : > { %588 = vmatpush.msra.mxu0 %v494_v10  ;;  %732 = vmatpush.msra.mxu1 %v494_v10  ;;  %v500_v26 = vld [vmem:[%s1659_s10 + $0x18] sm:$0xff]  ;;  %v1280_v27 = vld [vmem:[%s1659_s10 + $0xa8] sm:$0xff]  ;;  %v1318_v28 = vld [vmem:[%s1659_s10 + $0x140] sm:$0xff] }
  0x69   : > { %877 = vmatpush.msra.mxu2 %v493_v11  ;;  %1021 = vmatpush.msra.mxu3 %v493_v11  ;;  %v1355_v29 = vld [vmem:[%s1659_s10 + $0x1d0] sm:$0xff]  ;;  %v501_v30 = vld [vmem:[%s1659_s10 + $0x20] sm:$0xff]  ;;  %v1319_v32 = vld [vmem:[%s1659_s10 + $0x148] sm:$0xff] }
  0x6a   : > { %1333 = vmatmul.msk.f32.vlgmr.msra.gmra.mxu2 %vm515_vm1, %v1314_v12  ;;  %1370 = vmatmul.msk.f32.vlgmr.msra.gmra.mxu3 %vm515_vm1, %v1351_v13  ;;  %v1281_v31 = vld [vmem:[%s1659_s10 + $0xb0] sm:$0xff]  ;;  %v1356_v33 = vld [vmem:[%s1659_s10 + $0x1d8] sm:$0xff]  ;;  %v502_v34 = vld [vmem:[%s1659_s10 + $0x28] sm:$0xff] }
  0x6b   : > { %589 = vmatpush.msra.mxu0 %v493_v11  ;;  %733 = vmatpush.msra.mxu1 %v493_v11  ;;  %v1282_v35 = vld [vmem:[%s1659_s10 + $0xb8] sm:$0xff]  ;;  %v1320_v36 = vld [vmem:[%s1659_s10 + $0x150] sm:$0xff]  ;;  %v1357_v37 = vld [vmem:[%s1659_s10 + $0x1e0] sm:$0xff] }
  0x6c   : > { %1259 = vmatmul.msk.f32.vlgmr.msra.gmra.mxu0 %vm515_vm1, %v497_v14  ;;  %1296 = vmatmul.msk.f32.vlgmr.msra.gmra.mxu1 %vm515_vm1, %v1277_v15  ;;  %v503_v38 = vld [vmem:[%s1659_s10 + $0x30] sm:$0xff]  ;;  %v1283_v39 = vld [vmem:[%s1659_s10 + $0xc0] sm:$0xff]  ;;  %v1321_v40 = vld [vmem:[%s1659_s10 + $0x158] sm:$0xff] }
  0x6d   : > { %v1358_v41 = vld [vmem:[%s1659_s10 + $0x1e8] sm:$0xff]  ;;  %v504_v42 = vld [vmem:[%s1659_s10 + $0x38] sm:$0xff]  ;;  %v1322_v44 = vld [vmem:[%s1659_s10 + $0x160] sm:$0xff] }
  0x6e   : > { %v1284_v43 = vld [vmem:[%s1659_s10 + $0xc8] sm:$0xff]  ;;  %v1359_v45 = vld [vmem:[%s1659_s10 + $0x1f0] sm:$0xff]  ;;  %v505_v46 = vld [vmem:[%s1659_s10 + $0x40] sm:$0xff] }
  0x6f   : > { %v1285_v47 = vld [vmem:[%s1659_s10 + $0xd0] sm:$0xff]  ;;  %v1323_v48 = vld [vmem:[%s1659_s10 + $0x168] sm:$0xff]  ;;  %v1360_v49 = vld [vmem:[%s1659_s10 + $0x1f8] sm:$0xff] }
  0x70   : > { %v506_v50 = vld [vmem:[%s1659_s10 + $0x48] sm:$0xff]  ;;  %v1286_v51 = vld [vmem:[%s1659_s10 + $0xd8] sm:$0xff]  ;;  %v1324_v52 = vld [vmem:[%s1659_s10 + $0x170] sm:$0xff] }
  0x71   : > { %v1361_v53 = vld [vmem:[%s1659_s10 + $0x200] sm:$0xff]  ;;  %v507_v54 = vld [vmem:[%s1659_s10 + $0x50] sm:$0xff]  ;;  %v1325_v56 = vld [vmem:[%s1659_s10 + $0x178] sm:$0xff] }
  0x72   : > { %1334 = vmatmul.msk.f32.gmra.mxu2 %vm515_vm1, %v1315_v16  ;;  %1371 = vmatmul.msk.f32.gmra.mxu3 %vm515_vm1, %v1352_v17  ;;  %v1287_v55 = vld [vmem:[%s1659_s10 + $0xe0] sm:$0xff]  ;;  %v1362_v57 = vld [vmem:[%s1659_s10 + $0x208] sm:$0xff]  ;;  %v508_v58 = vld [vmem:[%s1659_s10 + $0x58] sm:$0xff] }
  0x73   : > { %v1288_v59 = vld [vmem:[%s1659_s10 + $0xe8] sm:$0xff]  ;;  %v1326_v60 = vld [vmem:[%s1659_s10 + $0x180] sm:$0xff]  ;;  %v1363_v61 = vld [vmem:[%s1659_s10 + $0x210] sm:$0xff] }
  0x74   : > { %1260 = vmatmul.msk.f32.gmra.mxu0 %vm515_vm1, %v498_v18  ;;  %1297 = vmatmul.msk.f32.gmra.mxu1 %vm515_vm1, %v1278_v19  ;;  %v509_v62 = vld [vmem:[%s1659_s10 + $0x60] sm:$0xff]  ;;  %v1289_v63 = vld [vmem:[%s1659_s10 + $0xf0] sm:$0xff]  ;;  %v1327_v0 = vld [vmem:[%s1659_s10 + $0x188] sm:$0xff] }
  0x75   : > { %v1364_v1 = vld [vmem:[%s1659_s10 + $0x218] sm:$0xff]  ;;  %v510_v2 = vld [vmem:[%s1659_s10 + $0x68] sm:$0xff]  ;;  %v1328_v4 = vld [vmem:[%s1659_s10 + $0x190] sm:$0xff] }
  0x76   : > { %v1290_v3 = vld [vmem:[%s1659_s10 + $0xf8] sm:$0xff]  ;;  %v1365_v5 = vld [vmem:[%s1659_s10 + $0x220] sm:$0xff]  ;;  %v511_v6 = vld [vmem:[%s1659_s10 + $0x70] sm:$0xff] }
  0x77   : > { %v1291_v7 = vld [vmem:[%s1659_s10 + $0x100] sm:$0xff]  ;;  %v1329_v8 = vld [vmem:[%s1659_s10 + $0x198] sm:$0xff]  ;;  %v1366_v9 = vld [vmem:[%s1659_s10 + $0x228] sm:$0xff] }
  0x78   : > { %v512_v10 = vld [vmem:[%s1659_s10 + $0x78] sm:$0xff]  ;;  %v1292_v11 = vld [vmem:[%s1659_s10 + $0x108] sm:$0xff]  ;;  %v1330_v12 = vld [vmem:[%s1659_s10 + $0x1a0] sm:$0xff] }
  0x79   : > { %v1367_v13 = vld [vmem:[%s1659_s10 + $0x230] sm:$0xff]  ;;  %v513_v16 = vld [vmem:[%s1659_s10 + $0x80] sm:$0xff] }
  0x7a   : > { %1335 = vmatmul.msk.f32.gmra.mxu2 %vm515_vm1, %v1316_v20  ;;  %1372 = vmatmul.msk.f32.gmra.mxu3 %vm515_vm1, %v1353_v21  ;;  %v1293_v17 = vld [vmem:[%s1659_s10 + $0x110] sm:$0xff] }
  0x7c   : > { %1261 = vmatmul.msk.f32.gmra.mxu0 %vm515_vm1, %v499_v22  ;;  %1298 = vmatmul.msk.f32.gmra.mxu1 %vm515_vm1, %v1279_v23  ;;  %v1802_v22 = vld [vmem:[%s1865_s2] ss:$0 sm:$0xff]  ;;  %v1331_v23 = vld [vmem:[%s1659_s10 + $0x1a8] sm:$0xff] }
  0x82   : > { %1336 = vmatmul.msk.f32.gmra.mxu2 %vm515_vm1, %v1317_v24  ;;  %1373 = vmatmul.msk.f32.gmra.mxu3 %vm515_vm1, %v1354_v25  ;;  %v1368_v24 = vld [vmem:[%s1659_s10 + $0x238] sm:$0xff] }
  0x84   : > { %1262 = vmatmul.msk.f32.gmra.mxu0 %vm515_vm1, %v500_v26  ;;  %1299 = vmatmul.msk.f32.gmra.mxu1 %vm515_vm1, %v1280_v27 }
  0x8a   : > { %1337 = vmatmul.msk.f32.gmra.mxu2 %vm515_vm1, %v1318_v28  ;;  %1374 = vmatmul.msk.f32.gmra.mxu3 %vm515_vm1, %v1355_v29  ;;  %v514_v28 = vld [vmem:[%s1659_s10 + $0x88] sm:$0xff]  ;;  %v1294_v29 = vld [vmem:[%s1659_s10 + $0x118] sm:$0xff] }
  0x8c   : > { %1263 = vmatmul.msk.f32.gmra.mxu0 %vm515_vm1, %v501_v30  ;;  %1300 = vmatmul.msk.f32.gmra.mxu1 %vm515_vm1, %v1281_v31 }
  0x92   : > { %1338 = vmatmul.msk.f32.gmra.mxu2 %vm515_vm1, %v1319_v32  ;;  %1375 = vmatmul.msk.f32.gmra.mxu3 %vm515_vm1, %v1356_v33 }
  0x94   : > { %1264 = vmatmul.msk.f32.gmra.mxu0 %vm515_vm1, %v502_v34  ;;  %1301 = vmatmul.msk.f32.gmra.mxu1 %vm515_vm1, %v1282_v35 }
  0x9a   : > { %1339 = vmatmul.msk.f32.gmra.mxu2 %vm515_vm1, %v1320_v36  ;;  %1376 = vmatmul.msk.f32.gmra.mxu3 %vm515_vm1, %v1357_v37 }
  0x9c   : > { %1265 = vmatmul.msk.f32.gmra.mxu0 %vm515_vm1, %v503_v38  ;;  %1302 = vmatmul.msk.f32.gmra.mxu1 %vm515_vm1, %v1283_v39 }
  0xa2   : > { %1340 = vmatmul.msk.f32.gmra.mxu2 %vm515_vm1, %v1321_v40  ;;  %1377 = vmatmul.msk.f32.gmra.mxu3 %vm515_vm1, %v1358_v41 }
  0xa4   : > { %1266 = vmatmul.msk.f32.gmra.mxu0 %vm515_vm1, %v504_v42  ;;  %1303 = vmatmul.msk.f32.gmra.mxu1 %vm515_vm1, %v1284_v43 }
  0xaa   : > { %1341 = vmatmul.msk.f32.gmra.mxu2 %vm515_vm1, %v1322_v44  ;;  %1378 = vmatmul.msk.f32.gmra.mxu3 %vm515_vm1, %v1359_v45 }
  0xac   : > { %1267 = vmatmul.msk.f32.gmra.mxu0 %vm515_vm1, %v505_v46  ;;  %1304 = vmatmul.msk.f32.gmra.mxu1 %vm515_vm1, %v1285_v47 }
  0xb2   : > { %1342 = vmatmul.msk.f32.gmra.mxu2 %vm515_vm1, %v1323_v48  ;;  %1379 = vmatmul.msk.f32.gmra.mxu3 %vm515_vm1, %v1360_v49 }
  0xb4   : > { %1268 = vmatmul.msk.f32.gmra.mxu0 %vm515_vm1, %v506_v50  ;;  %1305 = vmatmul.msk.f32.gmra.mxu1 %vm515_vm1, %v1286_v51 }
  0xba   : > { %1343 = vmatmul.msk.f32.gmra.mxu2 %vm515_vm1, %v1324_v52  ;;  %1380 = vmatmul.msk.f32.gmra.mxu3 %vm515_vm1, %v1361_v53 }
  0xbc   : > { %1269 = vmatmul.msk.f32.gmra.mxu0 %vm515_vm1, %v507_v54  ;;  %1306 = vmatmul.msk.f32.gmra.mxu1 %vm515_vm1, %v1287_v55 }
  0xc2   : > { %1344 = vmatmul.msk.f32.gmra.mxu2 %vm515_vm1, %v1325_v56  ;;  %1381 = vmatmul.msk.f32.gmra.mxu3 %vm515_vm1, %v1362_v57 }
  0xc4   : > { %1270 = vmatmul.msk.f32.gmra.mxu0 %vm515_vm1, %v508_v58  ;;  %1307 = vmatmul.msk.f32.gmra.mxu1 %vm515_vm1, %v1288_v59 }
  0xca   : > { %1345 = vmatmul.msk.f32.gmra.mxu2 %vm515_vm1, %v1326_v60  ;;  %1382 = vmatmul.msk.f32.gmra.mxu3 %vm515_vm1, %v1363_v61 }
  0xcc   : > { %1271 = vmatmul.msk.f32.gmra.mxu0 %vm515_vm1, %v509_v62  ;;  %1308 = vmatmul.msk.f32.gmra.mxu1 %vm515_vm1, %v1289_v63 }
  0xd2   : > { %1346 = vmatmul.msk.f32.gmra.mxu2 %vm515_vm1, %v1327_v0  ;;  %1383 = vmatmul.msk.f32.gmra.mxu3 %vm515_vm1, %v1364_v1 }
  0xd4   : > { %1272 = vmatmul.msk.f32.gmra.mxu0 %vm515_vm1, %v510_v2  ;;  %1309 = vmatmul.msk.f32.gmra.mxu1 %vm515_vm1, %v1290_v3 }
  0xda   : > { %1347 = vmatmul.msk.f32.gmra.mxu2 %vm515_vm1, %v1328_v4  ;;  %1384 = vmatmul.msk.f32.gmra.mxu3 %vm515_vm1, %v1365_v5 }
  0xdc   : > { %1273 = vmatmul.msk.f32.gmra.mxu0 %vm515_vm1, %v511_v6  ;;  %1310 = vmatmul.msk.f32.gmra.mxu1 %vm515_vm1, %v1291_v7 }
  0xe2   : > { %1348 = vmatmul.msk.f32.gmra.mxu2 %vm515_vm1, %v1329_v8  ;;  %1385 = vmatmul.msk.f32.gmra.mxu3 %vm515_vm1, %v1366_v9 }
  0xe4   : > { %1274 = vmatmul.msk.f32.gmra.mxu0 %vm515_vm1, %v512_v10  ;;  %1311 = vmatmul.msk.f32.gmra.mxu1 %vm515_vm1, %v1292_v11 }
  0xe9   : > { %v591_v14 = vpop.f32.mrf.mxu0  ;;  %v735_v15 = vpop.f32.mrf.mxu1 }
  0xea   : > { %1349 = vmatmul.msk.f32.gmra.mxu2 %vm515_vm1, %v1330_v12  ;;  %1386 = vmatmul.msk.f32.gmra.mxu3 %vm515_vm1, %v1367_v13  ;;  %v1077_v18 = vmax.f32 %v591_v14, %v735_v15 }
  0xec   : > { %1275 = vmatmul.msk.f32.gmra.mxu0 %vm515_vm1, %v513_v16  ;;  %1312 = vmatmul.msk.f32.gmra.mxu1 %vm515_vm1, %v1293_v17 }
  0xed   : > { %v879_v19 = vpop.f32.mrf.mxu2  ;;  %v1023_v20 = vpop.f32.mrf.mxu3 }
  0xee   : > { %v1095_v21 = vmax.f32 %v879_v19, %v1023_v20 }
  0xf0   : > { %v1113_v25 = vmax.f32 %v1077_v18, %v1095_v21 }
  0xf1   : > { %v594_v26 = vpop.f32.mrf.mxu0  ;;  %v738_v27 = vpop.f32.mrf.mxu1 }
  0xf2   : > { %v1135_v30 = vadd.f32 %v1802_v22, %v1113_v25  ;;  %1350 = vmatmul.msk.f32.gmra.mxu2 %vm515_vm1, %v1331_v23  ;;  %1387 = vmatmul.msk.f32.gmra.mxu3 %vm515_vm1, %v1368_v24  ;;  %v1078_v32 = vmax.f32 %v594_v26, %v738_v27 }
  0xf4   : > { %v1153_v31 = vmax.f32 %v1135_v30, 0.0  ;;  %1276 = vmatmul.msk.f32.gmra.mxu0 %vm515_vm1, %v514_v28  ;;  %1313 = vmatmul.msk.f32.gmra.mxu1 %vm515_vm1, %v1294_v29 }
  0xf5   : > { %v882_v33 = vpop.f32.mrf.mxu2  ;;  %v1026_v34 = vpop.f32.mrf.mxu3 }
  0xf6   : > { %1171 = vst [vmem:[%s1814_s20] sm:$0xff] %v1153_v31  ;;  %v1096_v35 = vmax.f32 %v882_v33, %v1026_v34 }
  0xf8   : > { %v1114_v36 = vmax.f32 %v1078_v32, %v1096_v35 }
  0xf9   : > { %v597_v37 = vpop.f32.mrf.mxu0  ;;  %v741_v38 = vpop.f32.mrf.mxu1 }
  0xfa   : > { %v1136_v39 = vadd.f32 %v1802_v22, %v1114_v36  ;;  %v1079_v41 = vmax.f32 %v597_v37, %v741_v38 }
  0xfc   : > { %v1154_v40 = vmax.f32 %v1136_v39, 0.0 }
  0xfd   : > { %v885_v42 = vpop.f32.mrf.mxu2  ;;  %v1029_v43 = vpop.f32.mrf.mxu3 }
  0xfe   : > { %1172 = vst [vmem:[%s1814_s20 + $0x8] sm:$0xff] %v1154_v40  ;;  %v1097_v44 = vmax.f32 %v885_v42, %v1029_v43 }
 0x100   : > { %v1115_v45 = vmax.f32 %v1079_v41, %v1097_v44 }
 0x101   : > { %v600_v46 = vpop.f32.mrf.mxu0  ;;  %v744_v47 = vpop.f32.mrf.mxu1 }
 0x102   : > { %v1137_v48 = vadd.f32 %v1802_v22, %v1115_v45  ;;  %v1080_v50 = vmax.f32 %v600_v46, %v744_v47 }
 0x104   : > { %v1155_v49 = vmax.f32 %v1137_v48, 0.0 }
 0x105   : > { %v888_v51 = vpop.f32.mrf.mxu2  ;;  %v1032_v52 = vpop.f32.mrf.mxu3 }
 0x106   : > { %1173 = vst [vmem:[%s1814_s20 + $0x10] sm:$0xff] %v1155_v49  ;;  %v1098_v53 = vmax.f32 %v888_v51, %v1032_v52 }
 0x108   : > { %v1116_v54 = vmax.f32 %v1080_v50, %v1098_v53 }
 0x109   : > { %v603_v55 = vpop.f32.mrf.mxu0  ;;  %v747_v56 = vpop.f32.mrf.mxu1 }
 0x10a   : > { %v1138_v57 = vadd.f32 %v1802_v22, %v1116_v54  ;;  %v1081_v59 = vmax.f32 %v603_v55, %v747_v56 }
 0x10c   : > { %v1156_v58 = vmax.f32 %v1138_v57, 0.0 }
 0x10d   : > { %v891_v60 = vpop.f32.mrf.mxu2  ;;  %v1035_v61 = vpop.f32.mrf.mxu3 }
 0x10e   : > { %1174 = vst [vmem:[%s1814_s20 + $0x18] sm:$0xff] %v1156_v58  ;;  %v1099_v62 = vmax.f32 %v891_v60, %v1035_v61 }
 0x110   : > { %v1117_v63 = vmax.f32 %v1081_v59, %v1099_v62 }
 0x111   : > { %v606_v0 = vpop.f32.mrf.mxu0  ;;  %v750_v1 = vpop.f32.mrf.mxu1 }
 0x112   : > { %v1139_v2 = vadd.f32 %v1802_v22, %v1117_v63  ;;  %v1082_v4 = vmax.f32 %v606_v0, %v750_v1 }
 0x114   : > { %v1157_v3 = vmax.f32 %v1139_v2, 0.0 }
 0x115   : > { %v894_v5 = vpop.f32.mrf.mxu2  ;;  %v1038_v6 = vpop.f32.mrf.mxu3 }
 0x116   : > { %1175 = vst [vmem:[%s1814_s20 + $0x20] sm:$0xff] %v1157_v3  ;;  %v1100_v7 = vmax.f32 %v894_v5, %v1038_v6 }
 0x118   : > { %v1118_v8 = vmax.f32 %v1082_v4, %v1100_v7 }
 0x119   : > { %v609_v9 = vpop.f32.mrf.mxu0  ;;  %v753_v10 = vpop.f32.mrf.mxu1 }
 0x11a   : > { %v1140_v11 = vadd.f32 %v1802_v22, %v1118_v8  ;;  %v1083_v13 = vmax.f32 %v609_v9, %v753_v10 }
 0x11c   : > { %v1158_v12 = vmax.f32 %v1140_v11, 0.0 }
 0x11d   : > { %v897_v14 = vpop.f32.mrf.mxu2  ;;  %v1041_v15 = vpop.f32.mrf.mxu3 }
 0x11e   : > { %1176 = vst [vmem:[%s1814_s20 + $0x28] sm:$0xff] %v1158_v12  ;;  %v1101_v16 = vmax.f32 %v897_v14, %v1041_v15 }
 0x120   : > { %v1119_v17 = vmax.f32 %v1083_v13, %v1101_v16 }
 0x121   : > { %v612_v18 = vpop.f32.mrf.mxu0  ;;  %v756_v19 = vpop.f32.mrf.mxu1 }
 0x122   : > { %v1141_v20 = vadd.f32 %v1802_v22, %v1119_v17  ;;  %v1084_v23 = vmax.f32 %v612_v18, %v756_v19 }
 0x124   : > { %v1159_v21 = vmax.f32 %v1141_v20, 0.0 }
 0x125   : > { %v900_v24 = vpop.f32.mrf.mxu2  ;;  %v1044_v25 = vpop.f32.mrf.mxu3 }
 0x126   : > { %1177 = vst [vmem:[%s1814_s20 + $0x30] sm:$0xff] %v1159_v21  ;;  %v1102_v26 = vmax.f32 %v900_v24, %v1044_v25 }
 0x128   : > { %v1120_v27 = vmax.f32 %v1084_v23, %v1102_v26 }
 0x129   : > { %v615_v28 = vpop.f32.mrf.mxu0  ;;  %v759_v29 = vpop.f32.mrf.mxu1 }
 0x12a   : > { %v1142_v30 = vadd.f32 %v1802_v22, %v1120_v27  ;;  %v1085_v32 = vmax.f32 %v615_v28, %v759_v29 }
 0x12c   : > { %v1160_v31 = vmax.f32 %v1142_v30, 0.0 }
 0x12d   : > { %v903_v33 = vpop.f32.mrf.mxu2  ;;  %v1047_v34 = vpop.f32.mrf.mxu3 }
 0x12e   : > { %1178 = vst [vmem:[%s1814_s20 + $0x38] sm:$0xff] %v1160_v31  ;;  %v1103_v35 = vmax.f32 %v903_v33, %v1047_v34 }
 0x130   : > { %v1121_v36 = vmax.f32 %v1085_v32, %v1103_v35 }
 0x131   : > { %v618_v37 = vpop.f32.mrf.mxu0  ;;  %v762_v38 = vpop.f32.mrf.mxu1 }
 0x132   : > { %v1143_v39 = vadd.f32 %v1802_v22, %v1121_v36  ;;  %v1086_v41 = vmax.f32 %v618_v37, %v762_v38 }
 0x134   : > { %v1161_v40 = vmax.f32 %v1143_v39, 0.0 }
 0x135   : > { %v906_v42 = vpop.f32.mrf.mxu2  ;;  %v1050_v43 = vpop.f32.mrf.mxu3 }
 0x136   : > { %1179 = vst [vmem:[%s1814_s20 + $0x40] sm:$0xff] %v1161_v40  ;;  %v1104_v44 = vmax.f32 %v906_v42, %v1050_v43 }
 0x138   : > { %v1122_v45 = vmax.f32 %v1086_v41, %v1104_v44 }
 0x139   : > { %v621_v46 = vpop.f32.mrf.mxu0  ;;  %v765_v47 = vpop.f32.mrf.mxu1 }
 0x13a   : > { %v1144_v48 = vadd.f32 %v1802_v22, %v1122_v45  ;;  %v1087_v50 = vmax.f32 %v621_v46, %v765_v47 }
 0x13c   : > { %v1162_v49 = vmax.f32 %v1144_v48, 0.0 }
 0x13d   : > { %v909_v51 = vpop.f32.mrf.mxu2  ;;  %v1053_v52 = vpop.f32.mrf.mxu3 }
 0x13e   : > { %1180 = vst [vmem:[%s1814_s20 + $0x48] sm:$0xff] %v1162_v49  ;;  %v1105_v53 = vmax.f32 %v909_v51, %v1053_v52 }
 0x140   : > { %v1123_v54 = vmax.f32 %v1087_v50, %v1105_v53 }
 0x141   : > { %v624_v55 = vpop.f32.mrf.mxu0  ;;  %v768_v56 = vpop.f32.mrf.mxu1 }
 0x142   : > { %v1145_v57 = vadd.f32 %v1802_v22, %v1123_v54  ;;  %v1088_v59 = vmax.f32 %v624_v55, %v768_v56 }
 0x144   : > { %v1163_v58 = vmax.f32 %v1145_v57, 0.0 }
 0x145   : > { %v912_v60 = vpop.f32.mrf.mxu2  ;;  %v1056_v61 = vpop.f32.mrf.mxu3 }
 0x146   : > { %1181 = vst [vmem:[%s1814_s20 + $0x50] sm:$0xff] %v1163_v58  ;;  %v1106_v62 = vmax.f32 %v912_v60, %v1056_v61 }
 0x148   : > { %v1124_v63 = vmax.f32 %v1088_v59, %v1106_v62 }
 0x149   : > { %v627_v0 = vpop.f32.mrf.mxu0  ;;  %v771_v1 = vpop.f32.mrf.mxu1 }
 0x14a   : > { %v1146_v2 = vadd.f32 %v1802_v22, %v1124_v63  ;;  %v1089_v4 = vmax.f32 %v627_v0, %v771_v1 }
 0x14c   : > { %v1164_v3 = vmax.f32 %v1146_v2, 0.0 }
 0x14d   : > { %v915_v5 = vpop.f32.mrf.mxu2  ;;  %v1059_v6 = vpop.f32.mrf.mxu3 }
 0x14e   : > { %1182 = vst [vmem:[%s1814_s20 + $0x58] sm:$0xff] %v1164_v3  ;;  %v1107_v7 = vmax.f32 %v915_v5, %v1059_v6 }
 0x150   : > { %v1125_v8 = vmax.f32 %v1089_v4, %v1107_v7 }
 0x151   : > { %v630_v9 = vpop.f32.mrf.mxu0  ;;  %v774_v10 = vpop.f32.mrf.mxu1 }
 0x152   : > { %v1147_v11 = vadd.f32 %v1802_v22, %v1125_v8  ;;  %v1090_v13 = vmax.f32 %v630_v9, %v774_v10 }
 0x154   : > { %v1165_v12 = vmax.f32 %v1147_v11, 0.0 }
 0x155   : > { %v918_v14 = vpop.f32.mrf.mxu2  ;;  %v1062_v15 = vpop.f32.mrf.mxu3 }
 0x156   : > { %1183 = vst [vmem:[%s1814_s20 + $0x60] sm:$0xff] %v1165_v12  ;;  %v1108_v16 = vmax.f32 %v918_v14, %v1062_v15 }
 0x158   : > { %v1126_v17 = vmax.f32 %v1090_v13, %v1108_v16 }
 0x159   : > { %v633_v18 = vpop.f32.mrf.mxu0  ;;  %v777_v19 = vpop.f32.mrf.mxu1 }
 0x15a   : > { %v1148_v20 = vadd.f32 %v1802_v22, %v1126_v17  ;;  %v1091_v23 = vmax.f32 %v633_v18, %v777_v19 }
 0x15c   : > { %v1166_v21 = vmax.f32 %v1148_v20, 0.0 }
 0x15d   : > { %v921_v24 = vpop.f32.mrf.mxu2  ;;  %v1065_v25 = vpop.f32.mrf.mxu3 }
 0x15e   : > { %1184 = vst [vmem:[%s1814_s20 + $0x68] sm:$0xff] %v1166_v21  ;;  %v1109_v26 = vmax.f32 %v921_v24, %v1065_v25 }
 0x160   : > { %v1127_v27 = vmax.f32 %v1091_v23, %v1109_v26 }
 0x161   : > { %v636_v28 = vpop.f32.mrf.mxu0  ;;  %v780_v29 = vpop.f32.mrf.mxu1 }
 0x162   : > { %v1149_v30 = vadd.f32 %v1802_v22, %v1127_v27  ;;  %v1092_v32 = vmax.f32 %v636_v28, %v780_v29 }
 0x164   : > { %v1167_v31 = vmax.f32 %v1149_v30, 0.0 }
 0x165   : > { %v924_v33 = vpop.f32.mrf.mxu2  ;;  %v1068_v34 = vpop.f32.mrf.mxu3 }
 0x166   : > { %1185 = vst [vmem:[%s1814_s20 + $0x70] sm:$0xff] %v1167_v31  ;;  %v1110_v35 = vmax.f32 %v924_v33, %v1068_v34 }
 0x168   : > { %v1128_v36 = vmax.f32 %v1092_v32, %v1110_v35 }
 0x169   : > { %v639_v37 = vpop.f32.mrf.mxu0  ;;  %v783_v38 = vpop.f32.mrf.mxu1 }
 0x16a   : > { %v1150_v39 = vadd.f32 %v1802_v22, %v1128_v36  ;;  %v1093_v41 = vmax.f32 %v639_v37, %v783_v38 }
 0x16c   : > { %v1168_v40 = vmax.f32 %v1150_v39, 0.0 }
 0x16d   : > { %v927_v42 = vpop.f32.mrf.mxu2  ;;  %v1071_v43 = vpop.f32.mrf.mxu3 }
 0x16e   : > { %1186 = vst [vmem:[%s1814_s20 + $0x78] sm:$0xff] %v1168_v40  ;;  %v1111_v44 = vmax.f32 %v927_v42, %v1071_v43 }
 0x170   : > { %v1129_v45 = vmax.f32 %v1093_v41, %v1111_v44 }
 0x171   : > { %v642_v46 = vpop.f32.mrf.mxu0  ;;  %v786_v47 = vpop.f32.mrf.mxu1 }
 0x172   : > { %v1151_v48 = vadd.f32 %v1802_v22, %v1129_v45  ;;  %v1094_v50 = vmax.f32 %v642_v46, %v786_v47 }
 0x174   : > { %v1169_v49 = vmax.f32 %v1151_v48, 0.0 }
 0x175   : > { %v930_v51 = vpop.f32.mrf.mxu2  ;;  %v1074_v52 = vpop.f32.mrf.mxu3 }
 0x176   : > { %1187 = vst [vmem:[%s1814_s20 + $0x80] sm:$0xff] %v1169_v49  ;;  %v1112_v53 = vmax.f32 %v930_v51, %v1074_v52 }
 0x178   : > { %v1130_v54 = vmax.f32 %v1094_v50, %v1112_v53 }
 0x17a   : > { %v1152_v55 = vadd.f32 %v1802_v22, %v1130_v54 }
 0x17c   : > { %v1170_v56 = vmax.f32 %v1152_v55, 0.0 }
 0x17e   : > { %1188 = vst [vmem:[%s1814_s20 + $0x88] sm:$0xff] %v1170_v56 }
 0x17f PF: > { %p10_p9 = scmp.ge.s32.totalorder %s1479_s16, 4   ;;  %s1867_s12 = smov %s1436_s13 }
 0x180   : > { %s1868_s13 = smov %s1488_s19  ;;  %s1869_s14 = smov %s1479_s16 }
 0x181   :  { %12 = sbr.rel (!%p10_p9) target bundleno = 2 (0x2), region = 108 }

// kernel: model_forward.3
= control target key start
LH: loop header
LB: loop body
LE: loop exit
PB: predicated region body
PF: predicated region fallthrough
CT: control target
= control target key end

     0   :  { %vm140_vm0 = vcmask 1041408   ;;  %s2469_s0 = inlined_call_operand.vmem [shape: f32[128,250], index: 0, kind: input, shape index: {}]   ;;  %s2470_s1 = inlined_call_operand.vmem [shape: f32[250,128], index: 1, kind: input, shape index: {}]   ;;  %s2471_s2 = inlined_call_operand.vmem [shape: f32[1,128], index: 2, kind: input, shape index: {}]   ;;  %s2472_s3 = inlined_call_operand.vmem [shape: f32[16,128,128], index: 3, kind: input, shape index: {}]   ;;  %s2473_s4 = inlined_call_operand.vmem [shape: f32[1,128], index: 4, kind: input, shape index: {}]   ;;  %s2474_s5 = inlined_call_operand.vmem [shape: f32[128,128], index: 5, kind: input, shape index: {}]   ;;  %s2475_s6 = inlined_call_operand.vmem [shape: f32[1,128], index: 6, kind: input, shape index: {}]   ;;  %s2476_s7 = inlined_call_operand.hbm [shape: f32[2,128], index: 7, kind: output, shape index: {}]  }
   0x1   :  { %v74_v0 = vld [vmem:[%s2470_s1 + $0x78] sm:$0xff]  ;;  %v73_v2 = vld [vmem:[%s2470_s1 + $0x70] sm:$0xff]  ;;  %v72_v4 = vld [vmem:[%s2470_s1 + $0x68] sm:$0xff] }
   0x2   :  { %v90_v1 = vld [vmem:[%s2470_s1 + $0xf8] sm:$0x3]  ;;  %144 = vmatpush.msra.mxu0 %v74_v0  ;;  %v89_v3 = vld [vmem:[%s2470_s1 + $0xf0] sm:$0xff]  ;;  %v88_v5 = vld [vmem:[%s2470_s1 + $0xe8] sm:$0xff] }
   0x3   :  { %1014 = vmatpush.msk.msra.mxu1 %vm140_vm0, %v90_v1  ;;  %v71_v6 = vld [vmem:[%s2470_s1 + $0x60] sm:$0xff]  ;;  %v70_v8 = vld [vmem:[%s2470_s1 + $0x58] sm:$0xff]  ;;  %v69_v10 = vld [vmem:[%s2470_s1 + $0x50] sm:$0xff] }
   0x4   :  { %145 = vmatpush.msra.mxu0 %v73_v2  ;;  %v87_v7 = vld [vmem:[%s2470_s1 + $0xe0] sm:$0xff]  ;;  %v86_v9 = vld [vmem:[%s2470_s1 + $0xd8] sm:$0xff]  ;;  %v85_v11 = vld [vmem:[%s2470_s1 + $0xd0] sm:$0xff] }
   0x5   :  { %210 = vmatpush.msra.mxu1 %v89_v3  ;;  %v68_v12 = vld [vmem:[%s2470_s1 + $0x48] sm:$0xff]  ;;  %v67_v14 = vld [vmem:[%s2470_s1 + $0x40] sm:$0xff] }
   0x6   :  { %146 = vmatpush.msra.mxu0 %v72_v4  ;;  %v84_v13 = vld [vmem:[%s2470_s1 + $0xc8] sm:$0xff]  ;;  %v83_v15 = vld [vmem:[%s2470_s1 + $0xc0] sm:$0xff] }
   0x7   :  { %211 = vmatpush.msra.mxu1 %v88_v5 }
   0x8   :  { %147 = vmatpush.msra.mxu0 %v71_v6 }
   0x9   :  { %212 = vmatpush.msra.mxu1 %v87_v7 }
   0xa   :  { %148 = vmatpush.msra.mxu0 %v70_v8 }
   0xb   :  { %213 = vmatpush.msra.mxu1 %v86_v9 }
   0xc   :  { %149 = vmatpush.msra.mxu0 %v69_v10 }
   0xd   :  { %214 = vmatpush.msra.mxu1 %v85_v11 }
   0xe   :  { %150 = vmatpush.msra.mxu0 %v68_v12 }
   0xf   :  { %215 = vmatpush.msra.mxu1 %v84_v13 }
  0x10   :  { %12 = vsyncpa [#allocation3], 0  ;;  %v66_v16 = vld [vmem:[%s2470_s1 + $0x38] sm:$0xff]  ;;  %151 = vmatpush.msra.mxu0 %v67_v14  ;;  %v65_v18 = vld [vmem:[%s2470_s1 + $0x30] sm:$0xff]  ;;  %vm91_vm1 = vcmask 998400   ;;  %s1005_s22 = sshll.u32 %s2476_s7, 4  ;;  %s1006_s22 = int_to_ptr.hbm [resolvable:$true] %s1005_s22 }
  0x11   :  { %v82_v17 = vld [vmem:[%s2470_s1 + $0xb8] sm:$0xff]  ;;  %216 = vmatpush.msra.mxu1 %v83_v15  ;;  %v81_v19 = vld [vmem:[%s2470_s1 + $0xb0] sm:$0xff]  ;;  %v64_v20 = vld [vmem:[%s2470_s1 + $0x28] sm:$0xff] }
  0x12   :  { %152 = vmatpush.msra.mxu0 %v66_v16  ;;  %v80_v21 = vld [vmem:[%s2470_s1 + $0xa8] sm:$0xff]  ;;  %v63_v22 = vld [vmem:[%s2470_s1 + $0x20] sm:$0xff]  ;;  %v62_v24 = vld [vmem:[%s2470_s1 + $0x18] sm:$0xff] }
  0x13   :  { %217 = vmatpush.msra.mxu1 %v82_v17  ;;  %v79_v23 = vld [vmem:[%s2470_s1 + $0xa0] sm:$0xff]  ;;  %v78_v25 = vld [vmem:[%s2470_s1 + $0x98] sm:$0xff]  ;;  %v61_v26 = vld [vmem:[%s2470_s1 + $0x10] sm:$0xff] }
  0x14   :  { %153 = vmatpush.msra.mxu0 %v65_v18  ;;  %v77_v27 = vld [vmem:[%s2470_s1 + $0x90] sm:$0xff]  ;;  %v60_v28 = vld [vmem:[%s2470_s1 + $0x8] sm:$0xff]  ;;  %v59_v30 = vld [vmem:[%s2470_s1] sm:$0xff] }
  0x15   :  { %218 = vmatpush.msra.mxu1 %v81_v19  ;;  %v76_v29 = vld [vmem:[%s2470_s1 + $0x88] sm:$0xff]  ;;  %v75_v31 = vld [vmem:[%s2470_s1 + $0x80] sm:$0xff]  ;;  %v29_v34 = vld [vmem:[%s2469_s0 + $0x10] sm:$0xff] }
  0x16   :  { %154 = vmatpush.msra.mxu0 %v64_v20  ;;  %v27_v32 = vld [vmem:[%s2469_s0] sm:$0xff]  ;;  %v28_v33 = vld [vmem:[%s2469_s0 + $0x8] sm:$0xff]  ;;  %v30_v35 = vld [vmem:[%s2469_s0 + $0x18] sm:$0xff] }
  0x17   :  { %219 = vmatpush.msra.mxu1 %v80_v21  ;;  %v31_v36 = vld [vmem:[%s2469_s0 + $0x20] sm:$0xff]  ;;  %v32_v37 = vld [vmem:[%s2469_s0 + $0x28] sm:$0xff]  ;;  %v33_v38 = vld [vmem:[%s2469_s0 + $0x30] sm:$0xff] }
  0x18   :  { %155 = vmatpush.msra.mxu0 %v63_v22  ;;  %v34_v39 = vld [vmem:[%s2469_s0 + $0x38] sm:$0xff]  ;;  %v35_v40 = vld [vmem:[%s2469_s0 + $0x40] sm:$0xff]  ;;  %v36_v41 = vld [vmem:[%s2469_s0 + $0x48] sm:$0xff] }
  0x19   :  { %220 = vmatpush.msra.mxu1 %v79_v23  ;;  %v37_v42 = vld [vmem:[%s2469_s0 + $0x50] sm:$0xff]  ;;  %v38_v43 = vld [vmem:[%s2469_s0 + $0x58] sm:$0xff]  ;;  %v39_v44 = vld [vmem:[%s2469_s0 + $0x60] sm:$0xff] }
  0x1a   :  { %156 = vmatpush.msra.mxu0 %v62_v24  ;;  %v40_v45 = vld [vmem:[%s2469_s0 + $0x68] sm:$0xff]  ;;  %v41_v46 = vld [vmem:[%s2469_s0 + $0x70] sm:$0xff]  ;;  %v42_v47 = vld [vmem:[%s2469_s0 + $0x78] sm:$0xff] }
  0x1b   :  { %221 = vmatpush.msra.mxu1 %v78_v25  ;;  %v43_v48 = vld [vmem:[%s2469_s0 + $0x80] sm:$0xff]  ;;  %v44_v49 = vld [vmem:[%s2469_s0 + $0x88] sm:$0xff]  ;;  %v45_v50 = vld [vmem:[%s2469_s0 + $0x90] sm:$0xff] }
  0x1c   :  { %157 = vmatpush.msra.mxu0 %v61_v26  ;;  %v46_v51 = vld [vmem:[%s2469_s0 + $0x98] sm:$0xff]  ;;  %v47_v52 = vld [vmem:[%s2469_s0 + $0xa0] sm:$0xff]  ;;  %v48_v53 = vld [vmem:[%s2469_s0 + $0xa8] sm:$0xff] }
  0x1d   :  { %222 = vmatpush.msra.mxu1 %v77_v27  ;;  %v49_v54 = vld [vmem:[%s2469_s0 + $0xb0] sm:$0xff]  ;;  %v50_v55 = vld [vmem:[%s2469_s0 + $0xb8] sm:$0xff]  ;;  %v51_v56 = vld [vmem:[%s2469_s0 + $0xc0] sm:$0xff] }
  0x1e   :  { %158 = vmatpush.msra.mxu0 %v60_v28  ;;  %v52_v57 = vld [vmem:[%s2469_s0 + $0xc8] sm:$0xff]  ;;  %v53_v58 = vld [vmem:[%s2469_s0 + $0xd0] sm:$0xff]  ;;  %v54_v59 = vld [vmem:[%s2469_s0 + $0xd8] sm:$0xff] }
  0x1f   :  { %223 = vmatpush.msra.mxu1 %v76_v29  ;;  %v55_v60 = vld [vmem:[%s2469_s0 + $0xe0] sm:$0xff]  ;;  %v56_v61 = vld [vmem:[%s2469_s0 + $0xe8] sm:$0xff]  ;;  %v57_v62 = vld [vmem:[%s2469_s0 + $0xf0] sm:$0xff] }
  0x20   :  { %159 = vmatpush.msra.mxu0 %v59_v30  ;;  %v58_v63 = vld [vmem:[%s2469_s0 + $0xf8] sm:$0xff]  ;;  %v312_v8 = vld [vmem:[%s2472_s3 + $0x70] sm:$0xff]  ;;  %v311_v12 = vld [vmem:[%s2472_s3 + $0x68] sm:$0xff] }
  0x21   :  { %224 = vmatpush.msra.mxu1 %v75_v31  ;;  %160 = vmatmul.f32.vlgmr.msra.gmra.mxu0 %v27_v32  ;;  %v313_v6 = vld [vmem:[%s2472_s3 + $0x78] sm:$0xff]  ;;  %v1045_v11 = vld [vmem:[%s2472_s3 + $0xf0] sm:$0xff]  ;;  %v1044_v14 = vld [vmem:[%s2472_s3 + $0xe8] sm:$0xff] }
  0x22   :  { %1015 = vmatmul.msk.f32.vlgmr.msra.gmra.mxu1 %vm91_vm1, %v28_v33  ;;  %v1046_v7 = vld [vmem:[%s2472_s3 + $0xf8] sm:$0xff]  ;;  %354 = vmatpush.msra.mxu3 %v313_v6  ;;  %v310_v15 = vld [vmem:[%s2472_s3 + $0x60] sm:$0xff]  ;;  %v308_v19 = vld [vmem:[%s2472_s3 + $0x50] sm:$0xff] }
  0x23   :  { %334 = vmatpush.msra.mxu2 %v1046_v7  ;;  %v1043_v16 = vld [vmem:[%s2472_s3 + $0xe0] sm:$0xff]  ;;  %v309_v17 = vld [vmem:[%s2472_s3 + $0x58] sm:$0xff]  ;;  %v1041_v22 = vld [vmem:[%s2472_s3 + $0xd0] sm:$0xff] }
  0x24   :  { %355 = vmatpush.msra.mxu3 %v312_v8  ;;  %v1042_v18 = vld [vmem:[%s2472_s3 + $0xd8] sm:$0xff]  ;;  %v307_v23 = vld [vmem:[%s2472_s3 + $0x48] sm:$0xff]  ;;  %v306_v26 = vld [vmem:[%s2472_s3 + $0x40] sm:$0xff] }
  0x25   :  { %335 = vmatpush.msra.mxu2 %v1045_v11  ;;  %v1040_v25 = vld [vmem:[%s2472_s3 + $0xc8] sm:$0xff]  ;;  %v1039_v27 = vld [vmem:[%s2472_s3 + $0xc0] sm:$0xff]  ;;  %v305_v28 = vld [vmem:[%s2472_s3 + $0x38] sm:$0xff] }
  0x26   :  { %356 = vmatpush.msra.mxu3 %v311_v12  ;;  %v1038_v29 = vld [vmem:[%s2472_s3 + $0xb8] sm:$0xff]  ;;  %v304_v30 = vld [vmem:[%s2472_s3 + $0x30] sm:$0xff]  ;;  %v1152_v8 = vld [vmem:[%s2472_s3 + $0x448] sm:$0xff] }
  0x27   :  { %336 = vmatpush.msra.mxu2 %v1044_v14  ;;  %v1037_v33 = vld [vmem:[%s2472_s3 + $0xb0] sm:$0xff]  ;;  %v1060_v11 = vld [vmem:[%s2472_s3 + $0x168] sm:$0xff]  ;;  %v1075_v12 = vld [vmem:[%s2472_s3 + $0x1e0] sm:$0xff] }
  0x28   :  { %357 = vmatpush.msra.mxu3 %v310_v15  ;;  %v1151_v14 = vld [vmem:[%s2472_s3 + $0x440] sm:$0xff]  ;;  %v1168_v15 = vld [vmem:[%s2472_s3 + $0x4c8] sm:$0xff] }
  0x29   :  { %163 = vmatmul.f32.gmra.mxu0 %v29_v34  ;;  %337 = vmatpush.msra.mxu2 %v1043_v16  ;;  %v303_v34 = vld [vmem:[%s2472_s3 + $0x28] sm:$0xff]  ;;  %v1059_v16 = vld [vmem:[%s2472_s3 + $0x160] sm:$0xff] }
  0x2a   :  { %1016 = vmatmul.msk.f32.gmra.mxu1 %vm91_vm1, %v30_v35  ;;  %358 = vmatpush.msra.mxu3 %v309_v17  ;;  %v1074_v17 = vld [vmem:[%s2472_s3 + $0x1d8] sm:$0xff] }
  0x2b   :  { %338 = vmatpush.msra.mxu2 %v1042_v18 }
  0x2c   :  { %359 = vmatpush.msra.mxu3 %v308_v19  ;;  %v1150_v19 = vld [vmem:[%s2472_s3 + $0x438] sm:$0xff] }
  0x2d   :  { %339 = vmatpush.msra.mxu2 %v1041_v22  ;;  %v1073_v22 = vld [vmem:[%s2472_s3 + $0x1d0] sm:$0xff] }
  0x2e   :  { %360 = vmatpush.msra.mxu3 %v307_v23  ;;  %v1149_v23 = vld [vmem:[%s2472_s3 + $0x430] sm:$0xff] }
  0x2f   :  { %340 = vmatpush.msra.mxu2 %v1040_v25  ;;  %v1166_v25 = vld [vmem:[%s2472_s3 + $0x4b8] sm:$0xff] }
  0x30   :  { %361 = vmatpush.msra.mxu3 %v306_v26  ;;  %v1057_v26 = vld [vmem:[%s2472_s3 + $0x150] sm:$0xff] }
  0x31   :  { %166 = vmatmul.f32.gmra.mxu0 %v31_v36  ;;  %341 = vmatpush.msra.mxu2 %v1039_v27  ;;  %v1036_v36 = vld [vmem:[%s2472_s3 + $0xa8] sm:$0xff] }
  0x32   :  { %1017 = vmatmul.msk.f32.gmra.mxu1 %vm91_vm1, %v32_v37  ;;  %362 = vmatpush.msra.mxu3 %v305_v28  ;;  %v302_v37 = vld [vmem:[%s2472_s3 + $0x20] sm:$0xff]  ;;  %v1072_v27 = vld [vmem:[%s2472_s3 + $0x1c8] sm:$0xff] }
  0x33   :  { %342 = vmatpush.msra.mxu2 %v1038_v29 }
  0x34   :  { %363 = vmatpush.msra.mxu3 %v304_v30  ;;  %v1148_v30 = vld [vmem:[%s2472_s3 + $0x428] sm:$0xff] }
  0x35   :  { %343 = vmatpush.msra.mxu2 %v1037_v33  ;;  %v1056_v33 = vld [vmem:[%s2472_s3 + $0x148] sm:$0xff] }
  0x36   :  { %364 = vmatpush.msra.mxu3 %v303_v34  ;;  %v1071_v34 = vld [vmem:[%s2472_s3 + $0x1c0] sm:$0xff] }
  0x37   :  { %344 = vmatpush.msra.mxu2 %v1036_v36  ;;  %v1147_v36 = vld [vmem:[%s2472_s3 + $0x420] sm:$0xff] }
  0x38   :  { %365 = vmatpush.msra.mxu3 %v302_v37  ;;  %v1164_v37 = vld [vmem:[%s2472_s3 + $0x4a8] sm:$0xff] }
  0x39   :  { %169 = vmatmul.f32.gmra.mxu0 %v33_v38  ;;  %v1035_v38 = vld [vmem:[%s2472_s3 + $0xa0] sm:$0xff] }
  0x3a   :  { %1018 = vmatmul.msk.f32.gmra.mxu1 %vm91_vm1, %v34_v39  ;;  %v301_v39 = vld [vmem:[%s2472_s3 + $0x18] sm:$0xff]  ;;  %345 = vmatpush.msra.mxu2 %v1035_v38  ;;  %v1055_v38 = vld [vmem:[%s2472_s3 + $0x140] sm:$0xff] }
  0x3b   :  { %366 = vmatpush.msra.mxu3 %v301_v39  ;;  %v1070_v39 = vld [vmem:[%s2472_s3 + $0x1b8] sm:$0xff] }
  0x41   :  { %172 = vmatmul.f32.gmra.mxu0 %v35_v40  ;;  %v1158_v40 = vld [vmem:[%s2472_s3 + $0x478] sm:$0xff] }
  0x42   :  { %1019 = vmatmul.msk.f32.gmra.mxu1 %vm91_vm1, %v36_v41  ;;  %630 = vmatpush.msrb.mxu0 %v1158_v40 }
  0x49   :  { %175 = vmatmul.f32.gmra.mxu0 %v37_v42  ;;  %v1157_v42 = vld [vmem:[%s2472_s3 + $0x470] sm:$0xff] }
  0x4a   :  { %1020 = vmatmul.msk.f32.gmra.mxu1 %vm91_vm1, %v38_v43  ;;  %v1174_v43 = vld [vmem:[%s2472_s3 + $0x4f8] sm:$0xff]  ;;  %631 = vmatpush.msrb.mxu0 %v1157_v42 }
  0x4b   :  { %671 = vmatpush.msrb.mxu1 %v1174_v43  ;;  %v1146_v42 = vld [vmem:[%s2472_s3 + $0x418] sm:$0xff]  ;;  %v1163_v43 = vld [vmem:[%s2472_s3 + $0x4a0] sm:$0xff] }
  0x51   :  { %178 = vmatmul.f32.gmra.mxu0 %v39_v44  ;;  %v1034_v44 = vld [vmem:[%s2472_s3 + $0x98] sm:$0xff] }
  0x52   :  { %1021 = vmatmul.msk.f32.gmra.mxu1 %vm91_vm1, %v40_v45  ;;  %v300_v45 = vld [vmem:[%s2472_s3 + $0x10] sm:$0xff]  ;;  %346 = vmatpush.msra.mxu2 %v1034_v44  ;;  %v1054_v44 = vld [vmem:[%s2472_s3 + $0x138] sm:$0xff] }
  0x53   :  { %367 = vmatpush.msra.mxu3 %v300_v45  ;;  %v1069_v45 = vld [vmem:[%s2472_s3 + $0x1b0] sm:$0xff] }
  0x59   :  { %181 = vmatmul.f32.gmra.mxu0 %v41_v46 }
  0x5a   :  { %1022 = vmatmul.msk.f32.gmra.mxu1 %vm91_vm1, %v42_v47 }
  0x61   :  { %184 = vmatmul.f32.gmra.mxu0 %v43_v48  ;;  %v1033_v48 = vld [vmem:[%s2472_s3 + $0x90] sm:$0xff] }
  0x62   :  { %1023 = vmatmul.msk.f32.gmra.mxu1 %vm91_vm1, %v44_v49  ;;  %v299_v49 = vld [vmem:[%s2472_s3 + $0x8] sm:$0xff]  ;;  %347 = vmatpush.msra.mxu2 %v1033_v48  ;;  %v1053_v48 = vld [vmem:[%s2472_s3 + $0x130] sm:$0xff] }
  0x63   :  { %368 = vmatpush.msra.mxu3 %v299_v49  ;;  %v1068_v49 = vld [vmem:[%s2472_s3 + $0x1a8] sm:$0xff] }
  0x69   :  { %187 = vmatmul.f32.gmra.mxu0 %v45_v50  ;;  %v1156_v50 = vld [vmem:[%s2472_s3 + $0x468] sm:$0xff] }
  0x6a   :  { %1024 = vmatmul.msk.f32.gmra.mxu1 %vm91_vm1, %v46_v51  ;;  %632 = vmatpush.msrb.mxu0 %v1156_v50 }
  0x71   :  { %190 = vmatmul.f32.gmra.mxu0 %v47_v52  ;;  %v1173_v52 = vld [vmem:[%s2472_s3 + $0x4f0] sm:$0xff] }
  0x72   :  { %1025 = vmatmul.msk.f32.gmra.mxu1 %vm91_vm1, %v48_v53  ;;  %v1032_v53 = vld [vmem:[%s2472_s3 + $0x88] sm:$0xff] }
  0x73   :  { %672 = vmatpush.msrb.mxu1 %v1173_v52  ;;  %348 = vmatpush.msra.mxu2 %v1032_v53  ;;  %v1144_v53 = vld [vmem:[%s2472_s3 + $0x408] sm:$0xff] }
  0x79   :  { %193 = vmatmul.f32.gmra.mxu0 %v49_v54  ;;  %v298_v54 = vld [vmem:[%s2472_s3] sm:$0xff] }
  0x7a   :  { %1026 = vmatmul.msk.f32.gmra.mxu1 %vm91_vm1, %v50_v55  ;;  %v1155_v55 = vld [vmem:[%s2472_s3 + $0x460] sm:$0xff]  ;;  %369 = vmatpush.msra.mxu3 %v298_v54  ;;  %v1161_v54 = vld [vmem:[%s2472_s3 + $0x490] sm:$0xff] }
  0x7b   :  { %633 = vmatpush.msrb.mxu0 %v1155_v55  ;;  %v1052_v55 = vld [vmem:[%s2472_s3 + $0x128] sm:$0xff] }
  0x81   :  { %196 = vmatmul.f32.gmra.mxu0 %v51_v56  ;;  %v1172_v56 = vld [vmem:[%s2472_s3 + $0x4e8] sm:$0xff] }
  0x82   :  { %1027 = vmatmul.msk.f32.gmra.mxu1 %vm91_vm1, %v52_v57  ;;  %v1078_v57 = vld [vmem:[%s2472_s3 + $0x1f8] sm:$0xff] }
  0x83   :  { %673 = vmatpush.msrb.mxu1 %v1172_v56  ;;  %433 = vmatpush.msrb.mxu3 %v1078_v57  ;;  %v1067_v56 = vld [vmem:[%s2472_s3 + $0x1a0] sm:$0xff] }
  0x84   :  { %v1143_v57 = vld [vmem:[%s2472_s3 + $0x400] sm:$0xff] }
  0x89   :  { %199 = vmatmul.f32.gmra.mxu0 %v53_v58 }
  0x8a   :  { %1028 = vmatmul.msk.f32.gmra.mxu1 %vm91_vm1, %v54_v59  ;;  %v1031_v59 = vld [vmem:[%s2472_s3 + $0x80] sm:$0xff] }
  0x8b   :  { %349 = vmatpush.msra.mxu2 %v1031_v59  ;;  %v1160_v59 = vld [vmem:[%s2472_s3 + $0x488] sm:$0xff] }
  0x91   :  { %202 = vmatmul.f32.gmra.mxu0 %v55_v60  ;;  %v1154_v60 = vld [vmem:[%s2472_s3 + $0x458] sm:$0xff] }
  0x92   :  { %1029 = vmatmul.msk.f32.gmra.mxu1 %vm91_vm1, %v56_v61  ;;  %v1171_v61 = vld [vmem:[%s2472_s3 + $0x4e0] sm:$0xff]  ;;  %634 = vmatpush.msrb.mxu0 %v1154_v60 }
  0x93   :  { %674 = vmatpush.msrb.mxu1 %v1171_v61  ;;  %v1051_v60 = vld [vmem:[%s2472_s3 + $0x120] sm:$0xff]  ;;  %v1066_v61 = vld [vmem:[%s2472_s3 + $0x198] sm:$0xff] }
  0x99   :  { %205 = vmatmul.f32.gmra.mxu0 %v57_v62  ;;  %v1062_v62 = vld [vmem:[%s2472_s3 + $0x178] sm:$0xff] }
  0x9a   :  { %1030 = vmatmul.msk.f32.gmra.mxu1 %vm91_vm1, %v58_v63  ;;  %v1077_v63 = vld [vmem:[%s2472_s3 + $0x1f0] sm:$0xff]  ;;  %393 = vmatpush.msrb.mxu2 %v1062_v62  ;;  %v1222_v62 = vld [vmem:[%s2472_s3 + $0x678] sm:$0xff] }
  0x9b   :  { %434 = vmatpush.msrb.mxu3 %v1077_v63  ;;  %v1159_v63 = vld [vmem:[%s2472_s3 + $0x480] sm:$0xff] }
  0x9e   :  { %v161_v0 = vpop.f32.mrf.mxu0 }
  0x9f   :  { %v226_v1 = vpop.f32.mrf.mxu1 }
  0xa0   :  { %v1555_v2 = vadd.f32 %v226_v1, %v161_v0  ;;  %v1153_v0 = vld [vmem:[%s2472_s3 + $0x450] sm:$0xff]  ;;  %v1170_v1 = vld [vmem:[%s2472_s3 + $0x4d8] sm:$0xff] }
  0xa1   :  { %635 = vmatpush.msrb.mxu0 %v1153_v0  ;;  %675 = vmatpush.msrb.mxu1 %v1170_v1  ;;  %v1050_v0 = vld [vmem:[%s2472_s3 + $0x118] sm:$0xff]  ;;  %v1065_v1 = vld [vmem:[%s2472_s3 + $0x190] sm:$0xff] }
  0xa3   :  { %636 = vmatpush.msrb.mxu0 %v1152_v8  ;;  %v1220_v8 = vld [vmem:[%s2472_s3 + $0x668] sm:$0xff] }
  0xa5   :  { %637 = vmatpush.msrb.mxu0 %v1151_v14  ;;  %v1048_v14 = vld [vmem:[%s2472_s3 + $0x108] sm:$0xff] }
  0xa6   :  { %v164_v3 = vpop.f32.mrf.mxu0 }
  0xa7   :  { %v229_v4 = vpop.f32.mrf.mxu1  ;;  %638 = vmatpush.msrb.mxu0 %v1150_v19  ;;  %v1047_v19 = vld [vmem:[%s2472_s3 + $0x100] sm:$0xff] }
  0xa8   :  { %v1557_v5 = vadd.f32 %v229_v4, %v164_v3  ;;  %v1061_v3 = vld [vmem:[%s2472_s3 + $0x170] sm:$0xff]  ;;  %v1076_v4 = vld [vmem:[%s2472_s3 + $0x1e8] sm:$0xff] }
  0xa9   :  { %394 = vmatpush.msrb.mxu2 %v1061_v3  ;;  %435 = vmatpush.msrb.mxu3 %v1076_v4  ;;  %v1221_v3 = vld [vmem:[%s2472_s3 + $0x670] sm:$0xff]  ;;  %v1238_v4 = vld [vmem:[%s2472_s3 + $0x6f8] sm:$0xff] }
  0xaa   :  { %639 = vmatpush.msrb.mxu0 %v1149_v23  ;;  %v1234_v23 = vld [vmem:[%s2472_s3 + $0x6d8] sm:$0xff] }
  0xab   :  { %395 = vmatpush.msrb.mxu2 %v1060_v11  ;;  %436 = vmatpush.msrb.mxu3 %v1075_v12  ;;  %v1237_v12 = vld [vmem:[%s2472_s3 + $0x6f0] sm:$0xff] }
  0xac   :  { %640 = vmatpush.msrb.mxu0 %v1148_v30  ;;  %v1232_v30 = vld [vmem:[%s2472_s3 + $0x6c8] sm:$0xff] }
  0xad   :  { %396 = vmatpush.msrb.mxu2 %v1059_v16  ;;  %437 = vmatpush.msrb.mxu3 %v1074_v17  ;;  %v1219_v16 = vld [vmem:[%s2472_s3 + $0x660] sm:$0xff]  ;;  %v1236_v17 = vld [vmem:[%s2472_s3 + $0x6e8] sm:$0xff] }
  0xae   :  { %v167_v9 = vpop.f32.mrf.mxu0  ;;  %641 = vmatpush.msrb.mxu0 %v1147_v36  ;;  %v1230_v36 = vld [vmem:[%s2472_s3 + $0x6b8] sm:$0xff] }
  0xaf   :  { %v232_v10 = vpop.f32.mrf.mxu1  ;;  %438 = vmatpush.msrb.mxu3 %v1073_v22  ;;  %v1217_v22 = vld [vmem:[%s2472_s3 + $0x650] sm:$0xff] }
  0xb0   :  { %v1574_v13 = vadd.f32 %v232_v10, %v167_v9  ;;  %v1169_v9 = vld [vmem:[%s2472_s3 + $0x4d0] sm:$0xff]  ;;  %642 = vmatpush.msrb.mxu0 %v1146_v42 }
  0xb1   :  { %676 = vmatpush.msrb.mxu1 %v1169_v9  ;;  %439 = vmatpush.msrb.mxu3 %v1072_v27  ;;  %v1216_v27 = vld [vmem:[%s2472_s3 + $0x648] sm:$0xff]  ;;  %v1229_v42 = vld [vmem:[%s2472_s3 + $0x6b0] sm:$0xff] }
  0xb3   :  { %677 = vmatpush.msrb.mxu1 %v1168_v15  ;;  %440 = vmatpush.msrb.mxu3 %v1071_v34  ;;  %v1063_v15 = vld [vmem:[%s2472_s3 + $0x180] sm:$0xff]  ;;  %v1213_v34 = vld [vmem:[%s2472_s3 + $0x630] sm:$0xff] }
  0xb5   :  { %441 = vmatpush.msrb.mxu3 %v1070_v39  ;;  %v1212_v39 = vld [vmem:[%s2472_s3 + $0x628] sm:$0xff] }
  0xb6   :  { %v170_v20 = vpop.f32.mrf.mxu0 }
  0xb7   :  { %v235_v21 = vpop.f32.mrf.mxu1  ;;  %442 = vmatpush.msrb.mxu3 %v1069_v45  ;;  %v1210_v45 = vld [vmem:[%s2472_s3 + $0x618] sm:$0xff] }
  0xb8   :  { %v1600_v24 = vadd.f32 %v235_v21, %v170_v20  ;;  %v1167_v20 = vld [vmem:[%s2472_s3 + $0x4c0] sm:$0xff]  ;;  %v1058_v21 = vld [vmem:[%s2472_s3 + $0x158] sm:$0xff] }
  0xb9   :  { %678 = vmatpush.msrb.mxu1 %v1167_v20  ;;  %397 = vmatpush.msrb.mxu2 %v1058_v21  ;;  %v1218_v20 = vld [vmem:[%s2472_s3 + $0x658] sm:$0xff]  ;;  %v1235_v21 = vld [vmem:[%s2472_s3 + $0x6e0] sm:$0xff] }
  0xba   :  { %443 = vmatpush.msrb.mxu3 %v1068_v49 }
  0xbb   :  { %679 = vmatpush.msrb.mxu1 %v1166_v25  ;;  %398 = vmatpush.msrb.mxu2 %v1057_v26 }
  0xbc   :  { %444 = vmatpush.msrb.mxu3 %v1067_v56 }
  0xbd   :  { %399 = vmatpush.msrb.mxu2 %v1056_v33  ;;  %v1231_v33 = vld [vmem:[%s2472_s3 + $0x6c0] sm:$0xff] }
  0xbe   :  { %v173_v31 = vpop.f32.mrf.mxu0  ;;  %445 = vmatpush.msrb.mxu3 %v1066_v61 }
  0xbf   :  { %v238_v32 = vpop.f32.mrf.mxu1  ;;  %400 = vmatpush.msrb.mxu2 %v1055_v38 }
  0xc0   :  { %v1626_v35 = vadd.f32 %v238_v32, %v173_v31  ;;  %v1165_v31 = vld [vmem:[%s2472_s3 + $0x4b0] sm:$0xff]  ;;  %446 = vmatpush.msrb.mxu3 %v1065_v1 }
  0xc1   :  { %680 = vmatpush.msrb.mxu1 %v1165_v31  ;;  %401 = vmatpush.msrb.mxu2 %v1054_v44  ;;  %v1214_v31 = vld [vmem:[%s2472_s3 + $0x638] sm:$0xff]  ;;  %v1228_v44 = vld [vmem:[%s2472_s3 + $0x6a8] sm:$0xff] }
  0xc2   :  { %v274_v41 = vmax.f32 %v1555_v2, %v1626_v35  ;;  %v1109_v2 = vld [vmem:[%s2472_s3 + $0x2f0] sm:$0xff] }
  0xc3   :  { %681 = vmatpush.msrb.mxu1 %v1164_v37  ;;  %402 = vmatpush.msrb.mxu2 %v1053_v48  ;;  %v1226_v48 = vld [vmem:[%s2472_s3 + $0x698] sm:$0xff]  ;;  %v1093_v35 = vld [vmem:[%s2472_s3 + $0x270] sm:$0xff] }
  0xc5   :  { %682 = vmatpush.msrb.mxu1 %v1163_v43  ;;  %403 = vmatpush.msrb.mxu2 %v1052_v55  ;;  %v1211_v43 = vld [vmem:[%s2472_s3 + $0x620] sm:$0xff]  ;;  %v1225_v55 = vld [vmem:[%s2472_s3 + $0x690] sm:$0xff] }
  0xc6   :  { %v176_v46 = vpop.f32.mrf.mxu0 }
  0xc7   :  { %v241_v47 = vpop.f32.mrf.mxu1  ;;  %404 = vmatpush.msrb.mxu2 %v1051_v60  ;;  %v1224_v60 = vld [vmem:[%s2472_s3 + $0x688] sm:$0xff] }
  0xc8   :  { %v1666_v51 = vadd.f32 %v241_v47, %v176_v46  ;;  %v1145_v46 = vld [vmem:[%s2472_s3 + $0x410] sm:$0xff]  ;;  %v1162_v47 = vld [vmem:[%s2472_s3 + $0x498] sm:$0xff] }
  0xc9   :  { %643 = vmatpush.msrb.mxu0 %v1145_v46  ;;  %683 = vmatpush.msrb.mxu1 %v1162_v47  ;;  %v1227_v46 = vld [vmem:[%s2472_s3 + $0x6a0] sm:$0xff]  ;;  %v1209_v47 = vld [vmem:[%s2472_s3 + $0x610] sm:$0xff] }
  0xca   :  { %v275_v58 = vmax.f32 %v1557_v5, %v1666_v51  ;;  %405 = vmatpush.msrb.mxu2 %v1050_v0  ;;  %v1084_v5 = vld [vmem:[%s2472_s3 + $0x228] sm:$0xff] }
  0xcb   :  { %644 = vmatpush.msrb.mxu0 %v1144_v53  ;;  %684 = vmatpush.msrb.mxu1 %v1161_v54  ;;  %v1208_v54 = vld [vmem:[%s2472_s3 + $0x608] sm:$0xff] }
  0xcd   :  { %645 = vmatpush.msrb.mxu0 %v1143_v57  ;;  %685 = vmatpush.msrb.mxu1 %v1160_v59  ;;  %v1207_v59 = vld [vmem:[%s2472_s3 + $0x600] sm:$0xff] }
  0xce   :  { %v179_v6 = vpop.f32.mrf.mxu0 }
  0xcf   :  { %v244_v7 = vpop.f32.mrf.mxu1  ;;  %789 = vmatpush.msra.mxu0 %v1222_v62  ;;  %686 = vmatpush.msrb.mxu1 %v1159_v63  ;;  %v1981_v62 = vld [vmem:[%s2471_s2] ss:$0 sm:$0xff] }
  0xd0   :  { %v1721_v10 = vadd.f32 %v244_v7, %v179_v6  ;;  %v1049_v6 = vld [vmem:[%s2472_s3 + $0x110] sm:$0xff]  ;;  %v1064_v7 = vld [vmem:[%s2472_s3 + $0x188] sm:$0xff] }
  0xd1   :  { %790 = vmatpush.msra.mxu0 %v1221_v3  ;;  %830 = vmatpush.msra.mxu1 %v1238_v4  ;;  %v1110_v4 = vld [vmem:[%s2472_s3 + $0x2f8] sm:$0xff] }
  0xd2   :  { %v276_v18 = vmax.f32 %v1574_v13, %v1721_v10  ;;  %406 = vmatpush.msrb.mxu2 %v1049_v6  ;;  %447 = vmatpush.msrb.mxu3 %v1064_v7  ;;  %v1094_v7 = vld [vmem:[%s2472_s3 + $0x278] sm:$0xff]  ;;  %v1088_v13 = vld [vmem:[%s2472_s3 + $0x248] sm:$0xff]  ;;  %v1103_v10 = vld [vmem:[%s2472_s3 + $0x2c0] sm:$0xff] }
  0xd3   :  { %791 = vmatpush.msra.mxu0 %v1220_v8  ;;  %831 = vmatpush.msra.mxu1 %v1237_v12  ;;  %v1092_v8 = vld [vmem:[%s2472_s3 + $0x268] sm:$0xff]  ;;  %v1107_v12 = vld [vmem:[%s2472_s3 + $0x2e0] sm:$0xff] }
  0xd4   :  { %407 = vmatpush.msrb.mxu2 %v1048_v14  ;;  %448 = vmatpush.msrb.mxu3 %v1063_v15 }
  0xd5   :  { %792 = vmatpush.msra.mxu0 %v1219_v16  ;;  %832 = vmatpush.msra.mxu1 %v1236_v17 }
  0xd6   :  { %v182_v28 = vpop.f32.mrf.mxu0  ;;  %408 = vmatpush.msrb.mxu2 %v1047_v19 }
  0xd7   :  { %v247_v29 = vpop.f32.mrf.mxu1  ;;  %793 = vmatpush.msra.mxu0 %v1218_v20  ;;  %833 = vmatpush.msra.mxu1 %v1235_v21  ;;  %v1091_v20 = vld [vmem:[%s2472_s3 + $0x260] sm:$0xff]  ;;  %v1106_v21 = vld [vmem:[%s2472_s3 + $0x2d8] sm:$0xff] }
  0xd8   :  { %v1773_v32 = vadd.f32 %v247_v29, %v182_v28  ;;  %v1233_v28 = vld [vmem:[%s2472_s3 + $0x6d0] sm:$0xff]  ;;  %v1215_v29 = vld [vmem:[%s2472_s3 + $0x640] sm:$0xff] }
  0xd9   :  { %794 = vmatpush.msra.mxu0 %v1217_v22  ;;  %834 = vmatpush.msra.mxu1 %v1234_v23 }
  0xda   :  { %v277_v40 = vmax.f32 %v1600_v24, %v1773_v32  ;;  %v1099_v24 = vld [vmem:[%s2472_s3 + $0x2a0] sm:$0xff] }
  0xdb   :  { %795 = vmatpush.msra.mxu0 %v1216_v27  ;;  %835 = vmatpush.msra.mxu1 %v1233_v28  ;;  %v1090_v27 = vld [vmem:[%s2472_s3 + $0x258] sm:$0xff]  ;;  %v1083_v32 = vld [vmem:[%s2472_s3 + $0x220] sm:$0xff] }
  0xdd   :  { %796 = vmatpush.msra.mxu0 %v1215_v29  ;;  %836 = vmatpush.msra.mxu1 %v1232_v30  ;;  %v1089_v29 = vld [vmem:[%s2472_s3 + $0x250] sm:$0xff]  ;;  %v1104_v30 = vld [vmem:[%s2472_s3 + $0x2c8] sm:$0xff] }
  0xde   :  { %v1819_v50 = vpop.f32.mrf.mxu0 }
  0xdf   :  { %v1821_v52 = vpop.f32.mrf.mxu1  ;;  %797 = vmatpush.msra.mxu0 %v1214_v31  ;;  %837 = vmatpush.msra.mxu1 %v1231_v33 }
  0xe0   :  { %v251_v56 = vadd.f32 %v1821_v52, %v1819_v50  ;;  %v1223_v50 = vld [vmem:[%s2472_s3 + $0x680] sm:$0xff] }
  0xe1   :  { %798 = vmatpush.msra.mxu0 %v1213_v34  ;;  %838 = vmatpush.msra.mxu1 %v1230_v36 }
  0xe3   :  { %799 = vmatpush.msra.mxu0 %v1212_v39  ;;  %839 = vmatpush.msra.mxu1 %v1229_v42 }
  0xe5   :  { %800 = vmatpush.msra.mxu0 %v1211_v43  ;;  %840 = vmatpush.msra.mxu1 %v1228_v44  ;;  %v1102_v43 = vld [vmem:[%s2472_s3 + $0x2b8] sm:$0xff] }
  0xe6   :  { %v1874_v9 = vpop.f32.mrf.mxu0 }
  0xe7   :  { %v1876_v11 = vpop.f32.mrf.mxu1  ;;  %801 = vmatpush.msra.mxu0 %v1210_v45  ;;  %841 = vmatpush.msra.mxu1 %v1227_v46 }
  0xe8   :  { %v254_v31 = vadd.f32 %v1876_v11, %v1874_v9  ;;  %v1087_v11 = vld [vmem:[%s2472_s3 + $0x240] sm:$0xff] }
  0xe9   :  { %802 = vmatpush.msra.mxu0 %v1209_v47  ;;  %842 = vmatpush.msra.mxu1 %v1226_v48  ;;  %v1085_v48 = vld [vmem:[%s2472_s3 + $0x230] sm:$0xff] }
  0xeb   :  { %803 = vmatpush.msra.mxu0 %v1208_v54  ;;  %843 = vmatpush.msra.mxu1 %v1225_v55  ;;  %v1082_v54 = vld [vmem:[%s2472_s3 + $0x218] sm:$0xff]  ;;  %v1097_v55 = vld [vmem:[%s2472_s3 + $0x290] sm:$0xff] }
  0xed   :  { %804 = vmatpush.msra.mxu0 %v1207_v59  ;;  %844 = vmatpush.msra.mxu1 %v1224_v60  ;;  %v1081_v59 = vld [vmem:[%s2472_s3 + $0x210] sm:$0xff]  ;;  %v1096_v60 = vld [vmem:[%s2472_s3 + $0x288] sm:$0xff] }
  0xee   :  { %v1908_v25 = vpop.f32.mrf.mxu0 }
  0xef   :  { %v1910_v26 = vpop.f32.mrf.mxu1  ;;  %845 = vmatpush.msra.mxu1 %v1223_v50 }
  0xf0   :  { %v257_v16 = vadd.f32 %v1910_v26, %v1908_v25  ;;  %v1105_v25 = vld [vmem:[%s2472_s3 + $0x2d0] sm:$0xff] }
  0xf6   :  { %v1936_v37 = vpop.f32.mrf.mxu0 }
  0xf7   :  { %v1938_v38 = vpop.f32.mrf.mxu1 }
  0xf8   :  { %v260_v36 = vadd.f32 %v1938_v38, %v1936_v37  ;;  %v1086_v37 = vld [vmem:[%s2472_s3 + $0x238] sm:$0xff]  ;;  %v1101_v38 = vld [vmem:[%s2472_s3 + $0x2b0] sm:$0xff] }
  0xfe   :  { %v197_v49 = vpop.f32.mrf.mxu0 }
  0xff   :  { %v262_v53 = vpop.f32.mrf.mxu1 }
 0x100   :  { %v263_v57 = vadd.f32 %v262_v53, %v197_v49  ;;  %v1100_v49 = vld [vmem:[%s2472_s3 + $0x2a8] sm:$0xff] }
 0x102   :  { %v278_v61 = vmax.f32 %v251_v56, %v263_v57 }
 0x104   :  { %v282_v52 = vmax.f32 %v274_v41, %v278_v61  ;;  %v1108_v41 = vld [vmem:[%s2472_s3 + $0x2e8] sm:$0xff] }
 0x105   :  { %v1080_v61 = vld [vmem:[%s2472_s3 + $0x208] sm:$0xff] }
 0x106   :  { %v290_v63 = vadd.f32 %v1981_v62, %v282_v52  ;;  %v200_v0 = vpop.f32.mrf.mxu0  ;;  %v1142_v52 = vld [vmem:[%s2472_s3 + $0x3f8] sm:$0xff] }
 0x107   :  { %v265_v1 = vpop.f32.mrf.mxu1 }
 0x108   :  { %v294_v3 = vmax.f32 %v290_v63, 0.0  ;;  %v266_v26 = vadd.f32 %v265_v1, %v200_v0  ;;  %v1079_v63 = vld [vmem:[%s2472_s3 + $0x200] sm:$0xff]  ;;  %v1126_v0 = vld [vmem:[%s2472_s3 + $0x378] sm:$0xff]  ;;  %v1141_v1 = vld [vmem:[%s2472_s3 + $0x3f0] sm:$0xff] }
 0x10a   :  { %370 = vmatmul.f32.vlgmr.msra.gmra.mxu3 %v294_v3  ;;  %v332_v6 = vrot.slane %v294_v3, 2  ;;  %v431_v19 = vrot.slane %v294_v3, 6  ;;  %v391_v23 = vrot.slane %v294_v3, 4  ;;  %v279_v39 = vmax.f32 %v254_v31, %v266_v26  ;;  %v1125_v3 = vld [vmem:[%s2472_s3 + $0x370] sm:$0xff]  ;;  %v1115_v26 = vld [vmem:[%s2472_s3 + $0x320] sm:$0xff] }
 0x10b   :  { %512 = vmatpush.msra.mxu3 %v1110_v4  ;;  %v1140_v4 = vld [vmem:[%s2472_s3 + $0x3e8] sm:$0xff]  ;;  %v1113_v31 = vld [vmem:[%s2472_s3 + $0x310] sm:$0xff] }
 0x10c   :  { %350 = vmatmul.f32.vlgmr.msra.gmra.mxu2 %v332_v6  ;;  %v283_v46 = vmax.f32 %v275_v58, %v279_v39  ;;  %v1124_v6 = vld [vmem:[%s2472_s3 + $0x368] sm:$0xff] }
 0x10d   :  { %471 = vmatpush.msra.mxu2 %v1094_v7  ;;  %513 = vmatpush.msra.mxu3 %v1109_v2  ;;  %v1139_v7 = vld [vmem:[%s2472_s3 + $0x3e0] sm:$0xff] }
 0x10e   :  { %v203_v14 = vpop.f32.mrf.mxu0  ;;  %v291_v51 = vadd.f32 %v1981_v62, %v283_v46  ;;  %v1123_v2 = vld [vmem:[%s2472_s3 + $0x360] sm:$0xff]  ;;  %v1202_v46 = vld [vmem:[%s2472_s3 + $0x5d8] sm:$0xff] }
 0x10f   :  { %472 = vmatpush.msra.mxu2 %v1093_v35  ;;  %514 = vmatpush.msra.mxu3 %v1108_v41  ;;  %v268_v15 = vpop.f32.mrf.mxu1  ;;  %v1138_v35 = vld [vmem:[%s2472_s3 + $0x3d8] sm:$0xff] }
 0x110   :  { %v269_v17 = vadd.f32 %v268_v15, %v203_v14  ;;  %v2097_v57 = vmax.f32 %v291_v51, 0.0  ;;  %v1122_v41 = vld [vmem:[%s2472_s3 + $0x358] sm:$0xff]  ;;  %v1136_v14 = vld [vmem:[%s2472_s3 + $0x3c8] sm:$0xff]  ;;  %v1183_v51 = vld [vmem:[%s2472_s3 + $0x540] sm:$0xff] }
 0x111   :  { %473 = vmatpush.msra.mxu2 %v1092_v8  ;;  %515 = vmatpush.msra.mxu3 %v1107_v12  ;;  %v1137_v8 = vld [vmem:[%s2472_s3 + $0x3d0] sm:$0xff]  ;;  %v1120_v15 = vld [vmem:[%s2472_s3 + $0x348] sm:$0xff] }
 0x112   :  { %v280_v22 = vmax.f32 %v257_v16, %v269_v17  ;;  %449 = vmatmul.f32.vlgmr.msrb.gmra.mxu3 %v431_v19  ;;  %v510_v50 = vrot.slane %v2097_v57, 2  ;;  %v1121_v12 = vld [vmem:[%s2472_s3 + $0x350] sm:$0xff]  ;;  %v1135_v16 = vld [vmem:[%s2472_s3 + $0x3c0] sm:$0xff]  ;;  %v1134_v19 = vld [vmem:[%s2472_s3 + $0x3b8] sm:$0xff]  ;;  %v550_v39 = vrot.slane %v2097_v57, 4 }
 0x113   :  { %474 = vmatpush.msra.mxu2 %v1091_v20  ;;  %516 = vmatpush.msra.mxu3 %v1106_v21  ;;  %v1119_v17 = vld [vmem:[%s2472_s3 + $0x340] sm:$0xff]  ;;  %v1118_v20 = vld [vmem:[%s2472_s3 + $0x338] sm:$0xff]  ;;  %v1133_v21 = vld [vmem:[%s2472_s3 + $0x3b0] sm:$0xff] }
 0x114   :  { %v284_v28 = vmax.f32 %v276_v18, %v280_v22  ;;  %409 = vmatmul.f32.vlgmr.msrb.gmra.mxu2 %v391_v23  ;;  %v1117_v22 = vld [vmem:[%s2472_s3 + $0x330] sm:$0xff]  ;;  %v1132_v23 = vld [vmem:[%s2472_s3 + $0x3a8] sm:$0xff] }
 0x115   :  { %475 = vmatpush.msra.mxu2 %v1090_v27  ;;  %517 = vmatpush.msra.mxu3 %v1105_v25  ;;  %v1116_v27 = vld [vmem:[%s2472_s3 + $0x328] sm:$0xff]  ;;  %v1131_v25 = vld [vmem:[%s2472_s3 + $0x3a0] sm:$0xff] }
 0x116   :  { %v292_v33 = vadd.f32 %v1981_v62, %v284_v28  ;;  %v206_v18 = vpop.f32.mrf.mxu0  ;;  %v1130_v28 = vld [vmem:[%s2472_s3 + $0x398] sm:$0xff] }
 0x117   :  { %476 = vmatpush.msra.mxu2 %v1089_v29  ;;  %518 = vmatpush.msra.mxu3 %v1104_v30  ;;  %v271_v34 = vpop.f32.mrf.mxu1  ;;  %v1114_v29 = vld [vmem:[%s2472_s3 + $0x318] sm:$0xff]  ;;  %v1129_v30 = vld [vmem:[%s2472_s3 + $0x390] sm:$0xff] }
 0x118   :  { %v2045_v42 = vmax.f32 %v292_v33, 0.0  ;;  %v272_v9 = vadd.f32 %v271_v34, %v206_v18  ;;  %v1128_v33 = vld [vmem:[%s2472_s3 + $0x388] sm:$0xff]  ;;  %v590_v18 = vrot.slane %v2097_v57, 6  ;;  %v1206_v34 = vld [vmem:[%s2472_s3 + $0x5f8] sm:$0xff] }
 0x119   :  { %477 = vmatpush.msra.mxu2 %v1088_v13  ;;  %519 = vmatpush.msra.mxu3 %v1103_v10  ;;  %v1112_v13 = vld [vmem:[%s2472_s3 + $0x308] sm:$0xff]  ;;  %v1127_v10 = vld [vmem:[%s2472_s3 + $0x380] sm:$0xff] }
 0x11a   :  { %v281_v44 = vmax.f32 %v260_v36, %v272_v9  ;;  %646 = vmatmul.f32.vlgmr.msrb.gmra.mxu0 %v2045_v42  ;;  %v669_v45 = vrot.slane %v2045_v42, 2  ;;  %v1111_v36 = vld [vmem:[%s2472_s3 + $0x300] sm:$0xff]  ;;  %v1190_v9 = vld [vmem:[%s2472_s3 + $0x578] sm:$0xff] }
 0x11b   :  { %478 = vmatpush.msra.mxu2 %v1087_v11  ;;  %520 = vmatpush.msra.mxu3 %v1102_v43  ;;  %v1205_v11 = vld [vmem:[%s2472_s3 + $0x5f0] sm:$0xff] }
 0x11c   :  { %v285_v47 = vmax.f32 %v277_v40, %v281_v44  ;;  %687 = vmatmul.f32.vlgmr.msrb.gmra.mxu1 %v669_v45  ;;  %v1098_v40 = vld [vmem:[%s2472_s3 + $0x298] sm:$0xff]  ;;  %v1189_v43 = vld [vmem:[%s2472_s3 + $0x570] sm:$0xff]  ;;  %v1204_v44 = vld [vmem:[%s2472_s3 + $0x5e8] sm:$0xff] }
 0x11d   :  { %479 = vmatpush.msra.mxu2 %v1086_v37  ;;  %521 = vmatpush.msra.mxu3 %v1101_v38  ;;  %v1188_v37 = vld [vmem:[%s2472_s3 + $0x568] sm:$0xff]  ;;  %v1203_v38 = vld [vmem:[%s2472_s3 + $0x5e0] sm:$0xff] }
 0x11e   :  { %v293_v53 = vadd.f32 %v1981_v62, %v285_v47  ;;  %v1095_v62 = vld [vmem:[%s2472_s3 + $0x280] sm:$0xff]  ;;  %v1186_v47 = vld [vmem:[%s2472_s3 + $0x558] sm:$0xff] }
 0x11f   :  { %480 = vmatpush.msra.mxu2 %v1085_v48  ;;  %522 = vmatpush.msra.mxu3 %v1100_v49  ;;  %v1187_v45 = vld [vmem:[%s2472_s3 + $0x560] sm:$0xff]  ;;  %v1201_v48 = vld [vmem:[%s2472_s3 + $0x5d0] sm:$0xff] }
 0x120   :  { %v2081_v58 = vmax.f32 %v293_v53, 0.0  ;;  %v1185_v49 = vld [vmem:[%s2472_s3 + $0x550] sm:$0xff]  ;;  %v1200_v53 = vld [vmem:[%s2472_s3 + $0x5c8] sm:$0xff] }
 0x121   :  { %481 = vmatpush.msra.mxu2 %v1084_v5  ;;  %523 = vmatpush.msra.mxu3 %v1099_v24  ;;  %v1184_v5 = vld [vmem:[%s2472_s3 + $0x548] sm:$0xff]  ;;  %v1199_v24 = vld [vmem:[%s2472_s3 + $0x5c0] sm:$0xff] }
 0x122   :  { %805 = vmatmul.f32.vlgmr.msra.gmra.mxu0 %v2081_v58  ;;  %v828_v56 = vrot.slane %v2081_v58, 2 }
 0x123   :  { %482 = vmatpush.msra.mxu2 %v1083_v32  ;;  %524 = vmatpush.msra.mxu3 %v1098_v40  ;;  %v1198_v32 = vld [vmem:[%s2472_s3 + $0x5b8] sm:$0xff] }
 0x124   :  { %846 = vmatmul.f32.vlgmr.msra.gmra.mxu1 %v828_v56  ;;  %v1182_v40 = vld [vmem:[%s2472_s3 + $0x538] sm:$0xff]  ;;  %v1196_v56 = vld [vmem:[%s2472_s3 + $0x5a8] sm:$0xff] }
 0x125   :  { %483 = vmatpush.msra.mxu2 %v1082_v54  ;;  %525 = vmatpush.msra.mxu3 %v1097_v55  ;;  %v1197_v54 = vld [vmem:[%s2472_s3 + $0x5b0] sm:$0xff] }
 0x126   :  { %v1181_v55 = vld [vmem:[%s2472_s3 + $0x530] sm:$0xff] }
 0x127   :  { %484 = vmatpush.msra.mxu2 %v1081_v59  ;;  %526 = vmatpush.msra.mxu3 %v1096_v60  ;;  %v1195_v59 = vld [vmem:[%s2472_s3 + $0x5a0] sm:$0xff] }
 0x128   :  { %v1179_v60 = vld [vmem:[%s2472_s3 + $0x520] sm:$0xff] }
 0x129   :  { %485 = vmatpush.msra.mxu2 %v1080_v61  ;;  %527 = vmatpush.msra.mxu3 %v1095_v62  ;;  %v1194_v61 = vld [vmem:[%s2472_s3 + $0x598] sm:$0xff] }
 0x12a   :  { %528 = vmatmul.f32.vlgmr.msra.gmra.mxu3 %v510_v50  ;;  %v1178_v62 = vld [vmem:[%s2472_s3 + $0x518] sm:$0xff]  ;;  %v1193_v50 = vld [vmem:[%s2472_s3 + $0x590] sm:$0xff] }
 0x12b   :  { %592 = vmatpush.msrb.mxu3 %v1142_v52  ;;  %486 = vmatpush.msra.mxu2 %v1079_v63  ;;  %v1177_v52 = vld [vmem:[%s2472_s3 + $0x510] sm:$0xff]  ;;  %v1192_v63 = vld [vmem:[%s2472_s3 + $0x588] sm:$0xff] }
 0x12c   :  { %487 = vmatmul.f32.vlgmr.msra.gmra.mxu2 %v2097_v57  ;;  %v1180_v57 = vld [vmem:[%s2472_s3 + $0x528] sm:$0xff] }
 0x12d   :  { %552 = vmatpush.msrb.mxu2 %v1126_v0  ;;  %593 = vmatpush.msrb.mxu3 %v1141_v1  ;;  %v1176_v0 = vld [vmem:[%s2472_s3 + $0x508] sm:$0xff]  ;;  %v1191_v1 = vld [vmem:[%s2472_s3 + $0x580] sm:$0xff] }
 0x12f   :  { %553 = vmatpush.msrb.mxu2 %v1125_v3  ;;  %594 = vmatpush.msrb.mxu3 %v1140_v4  ;;  %v749_v3 = vrot.slane %v2045_v42, 6  ;;  %v1270_v4 = vld [vmem:[%s2472_s3 + $0x7f8] sm:$0xff] }
 0x131   :  { %554 = vmatpush.msrb.mxu2 %v1124_v6  ;;  %595 = vmatpush.msrb.mxu3 %v1139_v7  ;;  %v1175_v6 = vld [vmem:[%s2472_s3 + $0x500] sm:$0xff]  ;;  %v709_v7 = vrot.slane %v2045_v42, 4  ;;  %v1252_v42 = vld [vmem:[%s2472_s3 + $0x768] sm:$0xff] }
 0x133   :  { %555 = vmatpush.msrb.mxu2 %v1123_v2  ;;  %596 = vmatpush.msrb.mxu3 %v1138_v35  ;;  %v1254_v2 = vld [vmem:[%s2472_s3 + $0x778] sm:$0xff]  ;;  %v1269_v35 = vld [vmem:[%s2472_s3 + $0x7f0] sm:$0xff] }
 0x135   :  { %556 = vmatpush.msrb.mxu2 %v1122_v41  ;;  %597 = vmatpush.msrb.mxu3 %v1137_v8  ;;  %v1253_v41 = vld [vmem:[%s2472_s3 + $0x770] sm:$0xff]  ;;  %v1268_v8 = vld [vmem:[%s2472_s3 + $0x7e8] sm:$0xff] }
 0x137   :  { %557 = vmatpush.msrb.mxu2 %v1121_v12  ;;  %598 = vmatpush.msrb.mxu3 %v1136_v14  ;;  %v1267_v12 = vld [vmem:[%s2472_s3 + $0x7e0] sm:$0xff] }
 0x138   :  { %v1251_v14 = vld [vmem:[%s2472_s3 + $0x760] sm:$0xff] }
 0x139   :  { %558 = vmatpush.msrb.mxu2 %v1120_v15  ;;  %599 = vmatpush.msrb.mxu3 %v1135_v16  ;;  %v1266_v15 = vld [vmem:[%s2472_s3 + $0x7d8] sm:$0xff] }
 0x13a   :  { %v1250_v16 = vld [vmem:[%s2472_s3 + $0x758] sm:$0xff] }
 0x13b   :  { %559 = vmatpush.msrb.mxu2 %v1119_v17  ;;  %600 = vmatpush.msrb.mxu3 %v1134_v19  ;;  %v1265_v17 = vld [vmem:[%s2472_s3 + $0x7d0] sm:$0xff] }
 0x13c   :  { %v1249_v19 = vld [vmem:[%s2472_s3 + $0x750] sm:$0xff] }
 0x13d   :  { %560 = vmatpush.msrb.mxu2 %v1118_v20  ;;  %601 = vmatpush.msrb.mxu3 %v1133_v21  ;;  %v1264_v20 = vld [vmem:[%s2472_s3 + $0x7c8] sm:$0xff] }
 0x13e   :  { %v1248_v21 = vld [vmem:[%s2472_s3 + $0x748] sm:$0xff] }
 0x13f   :  { %561 = vmatpush.msrb.mxu2 %v1117_v22  ;;  %602 = vmatpush.msrb.mxu3 %v1132_v23  ;;  %v1263_v22 = vld [vmem:[%s2472_s3 + $0x7c0] sm:$0xff] }
 0x140   :  { %v1247_v23 = vld [vmem:[%s2472_s3 + $0x740] sm:$0xff] }
 0x141   :  { %562 = vmatpush.msrb.mxu2 %v1116_v27  ;;  %603 = vmatpush.msrb.mxu3 %v1131_v25  ;;  %v1262_v27 = vld [vmem:[%s2472_s3 + $0x7b8] sm:$0xff] }
 0x142   :  { %v1246_v25 = vld [vmem:[%s2472_s3 + $0x738] sm:$0xff] }
 0x143   :  { %563 = vmatpush.msrb.mxu2 %v1115_v26  ;;  %604 = vmatpush.msrb.mxu3 %v1130_v28  ;;  %v1261_v26 = vld [vmem:[%s2472_s3 + $0x7b0] sm:$0xff] }
 0x144   :  { %v1245_v28 = vld [vmem:[%s2472_s3 + $0x730] sm:$0xff] }
 0x145   :  { %564 = vmatpush.msrb.mxu2 %v1114_v29  ;;  %605 = vmatpush.msrb.mxu3 %v1129_v30  ;;  %v1260_v29 = vld [vmem:[%s2472_s3 + $0x7a8] sm:$0xff] }
 0x146   :  { %v1244_v30 = vld [vmem:[%s2472_s3 + $0x728] sm:$0xff] }
 0x147   :  { %565 = vmatpush.msrb.mxu2 %v1113_v31  ;;  %606 = vmatpush.msrb.mxu3 %v1128_v33  ;;  %v1259_v31 = vld [vmem:[%s2472_s3 + $0x7a0] sm:$0xff] }
 0x148   :  { %v1243_v33 = vld [vmem:[%s2472_s3 + $0x720] sm:$0xff] }
 0x149   :  { %566 = vmatpush.msrb.mxu2 %v1112_v13  ;;  %607 = vmatpush.msrb.mxu3 %v1127_v10  ;;  %v1258_v13 = vld [vmem:[%s2472_s3 + $0x798] sm:$0xff] }
 0x14a   :  { %608 = vmatmul.f32.vlgmr.msrb.gmra.mxu3 %v590_v18  ;;  %v1242_v10 = vld [vmem:[%s2472_s3 + $0x718] sm:$0xff]  ;;  %v1257_v18 = vld [vmem:[%s2472_s3 + $0x790] sm:$0xff] }
 0x14b   :  { %751 = vmatpush.msra.mxu3 %v1206_v34  ;;  %567 = vmatpush.msrb.mxu2 %v1111_v36  ;;  %v1241_v34 = vld [vmem:[%s2472_s3 + $0x710] sm:$0xff]  ;;  %v1256_v36 = vld [vmem:[%s2472_s3 + $0x788] sm:$0xff] }
 0x14c   :  { %568 = vmatmul.f32.vlgmr.msrb.gmra.mxu2 %v550_v39  ;;  %v1240_v39 = vld [vmem:[%s2472_s3 + $0x708] sm:$0xff] }
 0x14d   :  { %711 = vmatpush.msra.mxu2 %v1190_v9  ;;  %752 = vmatpush.msra.mxu3 %v1205_v11  ;;  %v1255_v9 = vld [vmem:[%s2472_s3 + $0x780] sm:$0xff]  ;;  %v908_v11 = vrot.slane %v2081_v58, 6 }
 0x14f   :  { %712 = vmatpush.msra.mxu2 %v1189_v43  ;;  %753 = vmatpush.msra.mxu3 %v1204_v44  ;;  %v1239_v43 = vld [vmem:[%s2472_s3 + $0x700] sm:$0xff]  ;;  %v868_v44 = vrot.slane %v2081_v58, 4 }
 0x150   :  { %v949_v58 = vld [vmem:[%s2474_s5 + $0x60] sm:$0xff] }
 0x151   :  { %713 = vmatpush.msra.mxu2 %v1188_v37  ;;  %754 = vmatpush.msra.mxu3 %v1203_v38  ;;  %v952_v37 = vld [vmem:[%s2474_s5 + $0x78] sm:$0xff]  ;;  %v951_v38 = vld [vmem:[%s2474_s5 + $0x70] sm:$0xff] }
 0x152   :  { %957 = vmatpush.msrb.mxu0 %v952_v37 }
 0x153   :  { %714 = vmatpush.msra.mxu2 %v1187_v45  ;;  %755 = vmatpush.msra.mxu3 %v1202_v46  ;;  %v950_v45 = vld [vmem:[%s2474_s5 + $0x68] sm:$0xff] }
 0x154   :  { %958 = vmatpush.msrb.mxu0 %v951_v38 }
 0x155   :  { %715 = vmatpush.msra.mxu2 %v1186_v47  ;;  %756 = vmatpush.msra.mxu3 %v1201_v48  ;;  %v948_v47 = vld [vmem:[%s2474_s5 + $0x58] sm:$0xff]  ;;  %v947_v48 = vld [vmem:[%s2474_s5 + $0x50] sm:$0xff] }
 0x156   :  { %959 = vmatpush.msrb.mxu0 %v950_v45 }
 0x157   :  { %716 = vmatpush.msra.mxu2 %v1185_v49  ;;  %757 = vmatpush.msra.mxu3 %v1200_v53  ;;  %v946_v49 = vld [vmem:[%s2474_s5 + $0x48] sm:$0xff] }
 0x158   :  { %960 = vmatpush.msrb.mxu0 %v949_v58 }
 0x159   :  { %717 = vmatpush.msra.mxu2 %v1184_v5  ;;  %758 = vmatpush.msra.mxu3 %v1199_v24  ;;  %v945_v5 = vld [vmem:[%s2474_s5 + $0x40] sm:$0xff]  ;;  %v944_v24 = vld [vmem:[%s2474_s5 + $0x38] sm:$0xff] }
 0x15a   :  { %961 = vmatpush.msrb.mxu0 %v948_v47 }
 0x15b   :  { %718 = vmatpush.msra.mxu2 %v1183_v51  ;;  %759 = vmatpush.msra.mxu3 %v1198_v32  ;;  %v943_v32 = vld [vmem:[%s2474_s5 + $0x30] sm:$0xff] }
 0x15c   :  { %962 = vmatpush.msrb.mxu0 %v947_v48 }
 0x15d   :  { %719 = vmatpush.msra.mxu2 %v1182_v40  ;;  %760 = vmatpush.msra.mxu3 %v1197_v54 }
 0x15e   :  { %963 = vmatpush.msrb.mxu0 %v946_v49 }
 0x15f   :  { %720 = vmatpush.msra.mxu2 %v1181_v55  ;;  %761 = vmatpush.msra.mxu3 %v1196_v56 }
 0x160   :  { %964 = vmatpush.msrb.mxu0 %v945_v5 }
 0x161   :  { %721 = vmatpush.msra.mxu2 %v1180_v57  ;;  %762 = vmatpush.msra.mxu3 %v1195_v59  ;;  %v942_v59 = vld [vmem:[%s2474_s5 + $0x28] sm:$0xff] }
 0x162   :  { %965 = vmatpush.msrb.mxu0 %v944_v24 }
 0x163   :  { %722 = vmatpush.msra.mxu2 %v1179_v60  ;;  %763 = vmatpush.msra.mxu3 %v1194_v61  ;;  %v941_v61 = vld [vmem:[%s2474_s5 + $0x20] sm:$0xff] }
 0x164   :  { %966 = vmatpush.msrb.mxu0 %v943_v32 }
 0x165   :  { %723 = vmatpush.msra.mxu2 %v1178_v62  ;;  %764 = vmatpush.msra.mxu3 %v1193_v50  ;;  %v940_v50 = vld [vmem:[%s2474_s5 + $0x18] sm:$0xff] }
 0x166   :  { %967 = vmatpush.msrb.mxu0 %v942_v59 }
 0x167   :  { %724 = vmatpush.msra.mxu2 %v1177_v52  ;;  %765 = vmatpush.msra.mxu3 %v1192_v63 }
 0x168   :  { %968 = vmatpush.msrb.mxu0 %v941_v61 }
 0x169   :  { %725 = vmatpush.msra.mxu2 %v1176_v0  ;;  %766 = vmatpush.msra.mxu3 %v1191_v1  ;;  %v939_v0 = vld [vmem:[%s2474_s5 + $0x10] sm:$0xff] }
 0x16a   :  { %767 = vmatmul.f32.vlgmr.msra.gmra.mxu3 %v749_v3  ;;  %969 = vmatpush.msrb.mxu0 %v940_v50  ;;  %v938_v3 = vld [vmem:[%s2474_s5 + $0x8] sm:$0xff] }
 0x16b   :  { %910 = vmatpush.msrb.mxu3 %v1270_v4  ;;  %726 = vmatpush.msra.mxu2 %v1175_v6  ;;  %v937_v4 = vld [vmem:[%s2474_s5] sm:$0xff] }
 0x16c   :  { %727 = vmatmul.f32.vlgmr.msra.gmra.mxu2 %v709_v7  ;;  %970 = vmatpush.msrb.mxu0 %v939_v0 }
 0x16d   :  { %870 = vmatpush.msrb.mxu2 %v1254_v2  ;;  %911 = vmatpush.msrb.mxu3 %v1269_v35 }
 0x16e   :  { %971 = vmatpush.msrb.mxu0 %v938_v3 }
 0x16f   :  { %871 = vmatpush.msrb.mxu2 %v1253_v41  ;;  %912 = vmatpush.msrb.mxu3 %v1268_v8 }
 0x170   :  { %972 = vmatpush.msrb.mxu0 %v937_v4 }
 0x171   :  { %872 = vmatpush.msrb.mxu2 %v1252_v42  ;;  %913 = vmatpush.msrb.mxu3 %v1267_v12 }
 0x173   :  { %873 = vmatpush.msrb.mxu2 %v1251_v14  ;;  %914 = vmatpush.msrb.mxu3 %v1266_v15 }
 0x175   :  { %874 = vmatpush.msrb.mxu2 %v1250_v16  ;;  %915 = vmatpush.msrb.mxu3 %v1265_v17 }
 0x177   :  { %875 = vmatpush.msrb.mxu2 %v1249_v19  ;;  %916 = vmatpush.msrb.mxu3 %v1264_v20 }
 0x179   :  { %876 = vmatpush.msrb.mxu2 %v1248_v21  ;;  %917 = vmatpush.msrb.mxu3 %v1263_v22 }
 0x17b   :  { %877 = vmatpush.msrb.mxu2 %v1247_v23  ;;  %918 = vmatpush.msrb.mxu3 %v1262_v27  ;;  %v1273_v23 = vld [vmem:[%s2473_s4] ss:$0 sm:$0xff]  ;;  %s1305_s4 = smov [#allocation2]  }
 0x17d   :  { %878 = vmatpush.msrb.mxu2 %v1246_v25  ;;  %919 = vmatpush.msrb.mxu3 %v1261_v26 }
 0x17f   :  { %879 = vmatpush.msrb.mxu2 %v1245_v28  ;;  %920 = vmatpush.msrb.mxu3 %v1260_v29  ;;  %v1274_v29 = vld [vmem:[%s2475_s6] ss:$0 sm:$0xff]  ;;  %s1003_s6 = sshll.u32 %s1305_s4, 4  ;;  %s1004_s6 = int_to_ptr.vmem [resolvable:$true] %s1003_s6 }
 0x181   :  { %880 = vmatpush.msrb.mxu2 %v1244_v30  ;;  %921 = vmatpush.msrb.mxu3 %v1259_v31 }
 0x183   :  { %881 = vmatpush.msrb.mxu2 %v1243_v33  ;;  %922 = vmatpush.msrb.mxu3 %v1258_v13 }
 0x185   :  { %882 = vmatpush.msrb.mxu2 %v1242_v10  ;;  %923 = vmatpush.msrb.mxu3 %v1257_v18 }
 0x187   :  { %883 = vmatpush.msrb.mxu2 %v1241_v34  ;;  %924 = vmatpush.msrb.mxu3 %v1256_v36 }
 0x189   :  { %884 = vmatpush.msrb.mxu2 %v1240_v39  ;;  %925 = vmatpush.msrb.mxu3 %v1255_v9 }
 0x18a   :  { %926 = vmatmul.f32.vlgmr.msrb.gmra.mxu3 %v908_v11 }
 0x18b   :  { %885 = vmatpush.msrb.mxu2 %v1239_v43 }
 0x18c   :  { %886 = vmatmul.f32.vlgmr.msrb.gmra.mxu2 %v868_v44 }
 0x18d   :  { %v371_v53 = vpop.f32.mrf.mxu3 }
 0x18f   :  { %v351_v46 = vpop.f32.mrf.mxu2 }
 0x190   :  { %v372_v40 = vadd.f32 %v371_v53, %v351_v46 }
 0x195   :  { %v450_v54 = vpop.f32.mrf.mxu3 }
 0x197   :  { %v410_v51 = vpop.f32.mrf.mxu2  ;;  %v647_v2 = vpop.f32.mrf.mxu0 }
 0x198   :  { %v413_v55 = vadd.f32 %v410_v51, %v372_v40 }
 0x199   :  { %v688_v41 = vpop.f32.mrf.mxu1 }
 0x19a   :  { %v453_v57 = vadd.f32 %v450_v54, %v413_v55 }
 0x19f   :  { %v806_v16 = vpop.f32.mrf.mxu0 }
 0x1a1   :  { %v847_v19 = vpop.f32.mrf.mxu1 }
 0x1ad   :  { %v529_v62 = vpop.f32.mrf.mxu3 }
 0x1af   :  { %v488_v56 = vpop.f32.mrf.mxu2 }
 0x1b0   :  { %v491_v60 = vadd.f32 %v488_v56, %v453_v57 }
 0x1b2   :  { %v532_v63 = vadd.f32 %v529_v62, %v491_v60 }
 0x1cd   :  { %v609_v6 = vpop.f32.mrf.mxu3 }
 0x1cf   :  { %v569_v52 = vpop.f32.mrf.mxu2 }
 0x1d0   :  { %v572_v1 = vadd.f32 %v569_v52, %v532_v63 }
 0x1d2   :  { %v612_v7 = vadd.f32 %v609_v6, %v572_v1 }
 0x1d4   :  { %v650_v35 = vadd.f32 %v647_v2, %v612_v7 }
 0x1d6   :  { %v691_v42 = vadd.f32 %v688_v41, %v650_v35 }
 0x1ed   :  { %v768_v14 = vpop.f32.mrf.mxu3 }
 0x1ef   :  { %v728_v8 = vpop.f32.mrf.mxu2 }
 0x1f0   :  { %v731_v12 = vadd.f32 %v728_v8, %v691_v42 }
 0x1f2   :  { %v771_v15 = vadd.f32 %v768_v14, %v731_v12 }
 0x1f4   :  { %v809_v17 = vadd.f32 %v806_v16, %v771_v15 }
 0x1f6   :  { %v850_v20 = vadd.f32 %v847_v19, %v809_v17 }
 0x20d   :  { %v927_v27 = vpop.f32.mrf.mxu3 }
 0x20f   :  { %v887_v21 = vpop.f32.mrf.mxu2 }
 0x210   :  { %v890_v22 = vadd.f32 %v887_v21, %v850_v20 }
 0x212   :  { %v930_v25 = vadd.f32 %v927_v27, %v890_v22 }
 0x214   :  { %v935_v26 = vadd.f32 %v1273_v23, %v930_v25 }
 0x216   :  { %v936_v28 = vmax.f32 %v935_v26, 0.0 }
 0x218   :  { %973 = vmatmul.f32.vlgmr.msrb.gmra.mxu0 %v936_v28 }
 0x295   :  { %v974_v30 = vpop.f32.mrf.mxu0 }
 0x296   :  { %v975_v31 = vadd.f32 %v1274_v29, %v974_v30 }
 0x298   :  { %v977_v33 = vsel %vm140_vm0, %v975_v31, -inf }
 0x299   :  { %v978_v13 = vrot.slane %v977_v33, 4 }
 0x29b   :  { %v979_v10 = vmax.f32 %v977_v33, %v978_v13 }
 0x29d   :  { %v980_v18 = vrot.slane %v979_v10, 2 }
 0x29f   :  { %v981_v34 = vmax.f32 %v979_v10, %v980_v18 }
 0x2a1   :  { %v982_v36 = vrot.slane %v981_v34, 1 }
 0x2a3   :  { %v983_v39 = vmax.f32 %v981_v34, %v982_v36 }
 0x2a5   :  { %v984_v9 = vsub.f32 %v975_v31, %v983_v39 }
 0x2a7   :  { %v985_v11 = vmul.f32 1.442695, %v984_v9 }
 0x2a9   :  { %1275 = vpow2.f32 %v985_v11 }
 0x2af   :  { %v1276_v43 = vpop.eup %1275 }
 0x2b0   :  { %v987_v44 = vsel %vm140_vm0, %v1276_v43, 0.0 }
 0x2b1   :  { %v988_v37 = vrot.slane %v987_v44, 4 }
 0x2b3   :  { %v989_v38 = vadd.f32 %v988_v37, %v987_v44 }
 0x2b5   :  { %v990_v45 = vrot.slane %v989_v38, 2 }
 0x2b7   :  { %v991_v58 = vadd.f32 %v990_v45, %v989_v38 }
 0x2b9   :  { %v992_v46 = vrot.slane %v991_v58, 1 }
 0x2bb   :  { %v993_v47 = vadd.f32 %v992_v46, %v991_v58 }
 0x2bd   :  { %1277 = vlog2.f32 %v993_v47 }
 0x2c3   :  { %v1278_v48 = vpop.eup %1277 }
 0x2c4   :  { %v995_v49 = vmul.f32 0.6931472, %v1278_v48 }
 0x2c6   :  { %v996_v53 = vsub.f32 %v984_v9, %v995_v49 }
 0x2c8   :  { %997 = vst [vmem:[#allocation2] sm:$0x3] %v996_v53 }
 0x2c9   :  { %1008 = dma.vmem_to_hbm [thread:$0]  %s1004_s6, 32, %s1006_s22, [#allocation3]  }
 0x2ca   :  { %1303 = dma.done.wait [#allocation3], 32  }
 0x2cb   :  { %1304 = vsyncadd [#allocation3], 4294967264 }
 0x2cc   :  { %1013 = vsyncpa [#allocation3], 1 }

</bundles_post_ra>
